<compile_context>
chip_gen: v5e
topology: v5e:2x2
jax: 0.10.0
libtpu: 0.0.40
codegen_flags: <defaults>
</compile_context>

<pallas_src>
import functools

import jax
import jax.numpy as jnp
import numpy as np
from jax.experimental import pallas as pl
from jax.experimental.pallas import tpu as pltpu


def _fused_sepconv_bn_kernel(x_ref, mask_ref, dww_ref, pww_ref, gamma_ref,
                             beta_ref, o_ref, *, l_valid, kw, inv_count, eps):
    # x_ref:    (cin, L + kw - 1)  whole batch, samples packed along lanes
    # mask_ref: (1, L)             1.0 on valid output lanes, 0.0 on pad lanes
    # dww_ref:  (cin, kw)          depthwise weights
    # pww_ref:  (cout, cin)        pointwise (1x1) weights
    # gamma/beta: (cout, 1)        BN affine parameters
    # o_ref:    (cout, L)          normalized output (lane-dense, L % 128 == 0)
    x = x_ref[...].astype(jnp.float32)
    dww = dww_ref[...].astype(jnp.float32)

    # Depthwise (groups == cin) conv along time: kw static lane-shifted FMAs
    # into one accumulator.  Each output lane s*T + tau (tau < t_out) only
    # needs input lanes s*T + tau + j <= s*T + T - 1, i.e. stays inside its own
    # sample's lane span; the trailing pad keeps every slice in bounds.
    acc = x[:, 0:l_valid] * dww[:, 0:1]
    for j in range(1, kw):
        acc = acc + x[:, j:j + l_valid] * dww[:, j:j + 1]

    # Pointwise 1x1 conv: one wide MXU contraction over the whole batch block.
    y = jnp.dot(pww_ref[...].astype(jnp.float32), acc,
                preferred_element_type=jnp.float32)          # (cout, L)

    # Train-mode BN statistics over valid lanes only (pad lanes masked out).
    ym = y * mask_ref[...]
    ysum = jnp.sum(ym, axis=-1, keepdims=True)               # (cout, 1)
    ysq = jnp.sum(ym * ym, axis=-1, keepdims=True)           # (cout, 1)

    # Fused BN epilogue: per-channel scale/shift computed once, then one FMA
    # pass over the resident activation (y never goes to HBM un-normalized).
    mean = ysum * inv_count
    var = ysq * inv_count - mean * mean                      # biased variance
    scale = gamma_ref[...] * jax.lax.rsqrt(var + eps)        # rsqrt -> EUP
    shift = beta_ref[...] - mean * scale
    o_ref[...] = (y * scale + shift).astype(o_ref.dtype)


def separable_conv2d_bn(x_nchw, dw_w, dw_b, pw_w, pw_b, gamma, beta, *,
                        stride=1, padding=0, eps=1e-5):
    """EEGNet-configuration SeparableConv2d + train-mode BatchNorm2d.

    x_nchw: (N, Cin, 1, T)   dw_w: (Cin, 1, 1, KW)   pw_w: (Cout, Cin, 1, 1)
    dw_b / pw_b are accepted for API parity but cancel exactly under
    train-mode BN and are therefore not used.
    """
    n, cin, h, t = x_nchw.shape
    kh, kw = dw_w.shape[2], dw_w.shape[3]
    cout = pw_w.shape[0]
    # Specialised to EEGNet's conv3 configuration: (1, K) kernel on H == 1
    # input, stride 1, no padding.
    assert h == 1 and kh == 1 and stride == 1 and padding == 0
    t_out = t - kw + 1
    del dw_b, pw_b  # cancel exactly under train-mode BN (see header comment)

    l_valid = n * t                     # packed lane length (multiple of T)
    l_pad = l_valid + kw - 1            # trailing pad so every tap slice is in-bounds

    # Layout plumbing (tiny tensors, no dtype cast of the activations):
    # channel-major, samples packed along the lane axis, small trailing pad.
    x_packed = jnp.swapaxes(x_nchw.reshape(n, cin, t), 0, 1).reshape(cin, l_valid)
    x_packed = jnp.pad(x_packed, ((0, 0), (0, kw - 1)))
    # Valid-lane mask for the BN statistics (excludes the per-sample tail).
    mask = ((jnp.arange(l_valid) % t) < t_out).astype(jnp.float32).reshape(1, l_valid)

    dww = dw_w.reshape(cin, kw)
    pww = pw_w.reshape(cout, cin)
    gamma2 = gamma.reshape(cout, 1).astype(jnp.float32)
    beta2 = beta.reshape(cout, 1).astype(jnp.float32)

    # VMEM budget (v7x has 64 MiB physical): in/out tiles double-buffered plus
    # a handful of y-sized live temporaries inside the unrolled tap loop.
    x_tile = cin * l_pad * 4
    y_tile = cout * l_valid * 4
    est_vmem = 2 * x_tile + 2 * y_tile + 6 * y_tile
    assert est_vmem <= 24 * 1024 * 1024, (
        "batch too large for the single-block fused kernel; "
        "TODO(synk): chunk the batch with a two-phase grid for very large N")

    kernel = functools.partial(_fused_sepconv_bn_kernel, l_valid=l_valid,
                               kw=kw, inv_count=1.0 / float(n * t_out), eps=eps)
    out_packed = pl.pallas_call(
        kernel,
        grid=(1,),
        in_specs=[
            pl.BlockSpec((cin, l_pad), lambda i: (0, 0)),
            pl.BlockSpec((1, l_valid), lambda i: (0, 0)),
            pl.BlockSpec((cin, kw), lambda i: (0, 0)),
            pl.BlockSpec((cout, cin), lambda i: (0, 0)),
            pl.BlockSpec((cout, 1), lambda i: (0, 0)),
            pl.BlockSpec((cout, 1), lambda i: (0, 0)),
        ],
        out_specs=pl.BlockSpec((cout, l_valid), lambda i: (0, 0)),
        out_shape=jax.ShapeDtypeStruct((cout, l_valid), jnp.float32),
        compiler_params=pltpu.CompilerParams(
            dimension_semantics=("arbitrary",),
            vmem_limit_bytes=32 * 1024 * 1024),
    )(x_packed, mask, dww, pww, gamma2, beta2)

    # Unpack: (cout, N, T) -> (N, cout, T) -> drop pad tail -> NCHW.
    out = jnp.swapaxes(out_packed.reshape(cout, n, t), 0, 1)[:, :, :t_out]
    return out.reshape(n, cout, 1, t_out)


def _reference(x, dw_w, dw_b, pw_w, pw_b, gamma, beta, *, eps=1e-5):
    """Pure-JAX reference mirroring the PyTorch forward (train-mode BN),
    including the conv biases the kernel drops."""
    dn = ("NCHW", "OIHW", "NCHW")
    y = jax.lax.conv_general_dilated(x, dw_w, (1, 1), [(0, 0), (0, 0)],
                                     dimension_numbers=dn,
                                     feature_group_count=x.shape[1])
    y = y + dw_b[None, :, None, None]
    y = jax.lax.conv_general_dilated(y, pw_w, (1, 1), [(0, 0), (0, 0)],
                                     dimension_numbers=dn)
    y = y + pw_b[None, :, None, None]
    mean = jnp.mean(y, axis=(0, 2, 3), keepdims=True)
    var = jnp.mean((y - mean) ** 2, axis=(0, 2, 3), keepdims=True)
    y = (y - mean) * jax.lax.rsqrt(var + eps)
    return y * gamma[None, :, None, None] + beta[None, :, None, None]


if __name__ == "__main__":
    # EEGNet conv3 = SeparableConv2d(F1*D=16, F2=16, kernel=(1, kernelLength//2=32))
    # applied to (N, 16, 1, T); T kept small here.
    N, CIN, COUT, T, KW = 2, 16, 16, 128, 32

    key = jax.random.PRNGKey(0)
    k = jax.random.split(key, 7)
    x = jax.random.normal(k[0], (N, CIN, 1, T), jnp.float32)
    dw_w = 0.2 * jax.random.normal(k[1], (CIN, 1, 1, KW), jnp.float32)
    dw_b = 0.1 * jax.random.normal(k[2], (CIN,), jnp.float32)
    pw_w = 0.2 * jax.random.normal(k[3], (COUT, CIN, 1, 1), jnp.float32)
    pw_b = 0.1 * jax.random.normal(k[4], (COUT,), jnp.float32)
    gamma = 1.0 + 0.1 * jax.random.normal(k[5], (COUT,), jnp.float32)
    beta = 0.1 * jax.random.normal(k[6], (COUT,), jnp.float32)

    out = separable_conv2d_bn(x, dw_w, dw_b, pw_w, pw_b, gamma, beta)
    out = jax.block_until_ready(out)

    ref = _reference(x, dw_w, dw_b, pw_w, pw_b, gamma, beta)
    np.testing.assert_allclose(np.asarray(out), np.asarray(ref),
                               rtol=1e-4, atol=2e-4)
    assert out.shape == (N, COUT, 1, T - KW + 1)
    print("KERNEL_OK")
</pallas_src>

<mosaic_0001>
module attributes {stable_mosaic.version = 11 : i64} {
  func.func @_fused_sepconv_bn_kernel(%arg0: i32, %arg1: memref<16x287xf32, #tpu.memory_space<vmem>>, %arg2: memref<1x256xf32, #tpu.memory_space<vmem>>, %arg3: memref<16x32xf32, #tpu.memory_space<vmem>>, %arg4: memref<16x16xf32, #tpu.memory_space<vmem>>, %arg5: memref<16x1xf32, #tpu.memory_space<vmem>>, %arg6: memref<16x1xf32, #tpu.memory_space<vmem>>, %arg7: memref<16x256xf32, #tpu.memory_space<vmem>>) attributes {dimension_semantics = [#tpu.dimension_semantics<arbitrary>], iteration_bounds = array<i64: 1>, scalar_prefetch = 0 : i64, scratch_operands = 0 : i64, tpu.core_type = #tpu.core_type<tc>, window_params = [{pipeline_mode = #tpu.pipeline_mode<synchronous>, transform_indices = @transform_0, window_bounds = array<i64: 16, 287>}, {pipeline_mode = #tpu.pipeline_mode<synchronous>, transform_indices = @transform_1, window_bounds = array<i64: 1, 256>}, {pipeline_mode = #tpu.pipeline_mode<synchronous>, transform_indices = @transform_2, window_bounds = array<i64: 16, 32>}, {pipeline_mode = #tpu.pipeline_mode<synchronous>, transform_indices = @transform_3, window_bounds = array<i64: 16, 16>}, {pipeline_mode = #tpu.pipeline_mode<synchronous>, transform_indices = @transform_4, window_bounds = array<i64: 16, 1>}, {pipeline_mode = #tpu.pipeline_mode<synchronous>, transform_indices = @transform_5, window_bounds = array<i64: 16, 1>}, {pipeline_mode = #tpu.pipeline_mode<synchronous>, transform_indices = @transform_6, window_bounds = array<i64: 16, 256>}]} {
    %c0 = arith.constant 0 : index
    %c0_0 = arith.constant 0 : index
    %0 = vector.load %arg1[%c0, %c0_0] : memref<16x287xf32, #tpu.memory_space<vmem>>, vector<16x287xf32>
    %c0_1 = arith.constant 0 : index
    %c0_2 = arith.constant 0 : index
    %1 = vector.load %arg3[%c0_1, %c0_2] : memref<16x32xf32, #tpu.memory_space<vmem>>, vector<16x32xf32>
    %2 = vector.extract_strided_slice %0 {offsets = [0, 0], sizes = [16, 256], strides = [1, 1]} : vector<16x287xf32> to vector<16x256xf32>
    %3 = vector.extract_strided_slice %1 {offsets = [0, 0], sizes = [16, 1], strides = [1, 1]} : vector<16x32xf32> to vector<16x1xf32>
    %4 = vector.broadcast %3 : vector<16x1xf32> to vector<16x256xf32>
    %5 = arith.mulf %2, %4 : vector<16x256xf32>
    %6 = vector.extract_strided_slice %0 {offsets = [0, 1], sizes = [16, 256], strides = [1, 1]} : vector<16x287xf32> to vector<16x256xf32>
    %7 = vector.extract_strided_slice %1 {offsets = [0, 1], sizes = [16, 1], strides = [1, 1]} : vector<16x32xf32> to vector<16x1xf32>
    %8 = vector.broadcast %7 : vector<16x1xf32> to vector<16x256xf32>
    %9 = arith.mulf %6, %8 : vector<16x256xf32>
    %10 = arith.addf %5, %9 : vector<16x256xf32>
    %11 = vector.extract_strided_slice %0 {offsets = [0, 2], sizes = [16, 256], strides = [1, 1]} : vector<16x287xf32> to vector<16x256xf32>
    %12 = vector.extract_strided_slice %1 {offsets = [0, 2], sizes = [16, 1], strides = [1, 1]} : vector<16x32xf32> to vector<16x1xf32>
    %13 = vector.broadcast %12 : vector<16x1xf32> to vector<16x256xf32>
    %14 = arith.mulf %11, %13 : vector<16x256xf32>
    %15 = arith.addf %10, %14 : vector<16x256xf32>
    %16 = vector.extract_strided_slice %0 {offsets = [0, 3], sizes = [16, 256], strides = [1, 1]} : vector<16x287xf32> to vector<16x256xf32>
    %17 = vector.extract_strided_slice %1 {offsets = [0, 3], sizes = [16, 1], strides = [1, 1]} : vector<16x32xf32> to vector<16x1xf32>
    %18 = vector.broadcast %17 : vector<16x1xf32> to vector<16x256xf32>
    %19 = arith.mulf %16, %18 : vector<16x256xf32>
    %20 = arith.addf %15, %19 : vector<16x256xf32>
    %21 = vector.extract_strided_slice %0 {offsets = [0, 4], sizes = [16, 256], strides = [1, 1]} : vector<16x287xf32> to vector<16x256xf32>
    %22 = vector.extract_strided_slice %1 {offsets = [0, 4], sizes = [16, 1], strides = [1, 1]} : vector<16x32xf32> to vector<16x1xf32>
    %23 = vector.broadcast %22 : vector<16x1xf32> to vector<16x256xf32>
    %24 = arith.mulf %21, %23 : vector<16x256xf32>
    %25 = arith.addf %20, %24 : vector<16x256xf32>
    %26 = vector.extract_strided_slice %0 {offsets = [0, 5], sizes = [16, 256], strides = [1, 1]} : vector<16x287xf32> to vector<16x256xf32>
    %27 = vector.extract_strided_slice %1 {offsets = [0, 5], sizes = [16, 1], strides = [1, 1]} : vector<16x32xf32> to vector<16x1xf32>
    %28 = vector.broadcast %27 : vector<16x1xf32> to vector<16x256xf32>
    %29 = arith.mulf %26, %28 : vector<16x256xf32>
    %30 = arith.addf %25, %29 : vector<16x256xf32>
    %31 = vector.extract_strided_slice %0 {offsets = [0, 6], sizes = [16, 256], strides = [1, 1]} : vector<16x287xf32> to vector<16x256xf32>
    %32 = vector.extract_strided_slice %1 {offsets = [0, 6], sizes = [16, 1], strides = [1, 1]} : vector<16x32xf32> to vector<16x1xf32>
    %33 = vector.broadcast %32 : vector<16x1xf32> to vector<16x256xf32>
    %34 = arith.mulf %31, %33 : vector<16x256xf32>
    %35 = arith.addf %30, %34 : vector<16x256xf32>
    %36 = vector.extract_strided_slice %0 {offsets = [0, 7], sizes = [16, 256], strides = [1, 1]} : vector<16x287xf32> to vector<16x256xf32>
    %37 = vector.extract_strided_slice %1 {offsets = [0, 7], sizes = [16, 1], strides = [1, 1]} : vector<16x32xf32> to vector<16x1xf32>
    %38 = vector.broadcast %37 : vector<16x1xf32> to vector<16x256xf32>
    %39 = arith.mulf %36, %38 : vector<16x256xf32>
    %40 = arith.addf %35, %39 : vector<16x256xf32>
    %41 = vector.extract_strided_slice %0 {offsets = [0, 8], sizes = [16, 256], strides = [1, 1]} : vector<16x287xf32> to vector<16x256xf32>
    %42 = vector.extract_strided_slice %1 {offsets = [0, 8], sizes = [16, 1], strides = [1, 1]} : vector<16x32xf32> to vector<16x1xf32>
    %43 = vector.broadcast %42 : vector<16x1xf32> to vector<16x256xf32>
    %44 = arith.mulf %41, %43 : vector<16x256xf32>
    %45 = arith.addf %40, %44 : vector<16x256xf32>
    %46 = vector.extract_strided_slice %0 {offsets = [0, 9], sizes = [16, 256], strides = [1, 1]} : vector<16x287xf32> to vector<16x256xf32>
    %47 = vector.extract_strided_slice %1 {offsets = [0, 9], sizes = [16, 1], strides = [1, 1]} : vector<16x32xf32> to vector<16x1xf32>
    %48 = vector.broadcast %47 : vector<16x1xf32> to vector<16x256xf32>
    %49 = arith.mulf %46, %48 : vector<16x256xf32>
    %50 = arith.addf %45, %49 : vector<16x256xf32>
    %51 = vector.extract_strided_slice %0 {offsets = [0, 10], sizes = [16, 256], strides = [1, 1]} : vector<16x287xf32> to vector<16x256xf32>
    %52 = vector.extract_strided_slice %1 {offsets = [0, 10], sizes = [16, 1], strides = [1, 1]} : vector<16x32xf32> to vector<16x1xf32>
    %53 = vector.broadcast %52 : vector<16x1xf32> to vector<16x256xf32>
    %54 = arith.mulf %51, %53 : vector<16x256xf32>
    %55 = arith.addf %50, %54 : vector<16x256xf32>
    %56 = vector.extract_strided_slice %0 {offsets = [0, 11], sizes = [16, 256], strides = [1, 1]} : vector<16x287xf32> to vector<16x256xf32>
    %57 = vector.extract_strided_slice %1 {offsets = [0, 11], sizes = [16, 1], strides = [1, 1]} : vector<16x32xf32> to vector<16x1xf32>
    %58 = vector.broadcast %57 : vector<16x1xf32> to vector<16x256xf32>
    %59 = arith.mulf %56, %58 : vector<16x256xf32>
    %60 = arith.addf %55, %59 : vector<16x256xf32>
    %61 = vector.extract_strided_slice %0 {offsets = [0, 12], sizes = [16, 256], strides = [1, 1]} : vector<16x287xf32> to vector<16x256xf32>
    %62 = vector.extract_strided_slice %1 {offsets = [0, 12], sizes = [16, 1], strides = [1, 1]} : vector<16x32xf32> to vector<16x1xf32>
    %63 = vector.broadcast %62 : vector<16x1xf32> to vector<16x256xf32>
    %64 = arith.mulf %61, %63 : vector<16x256xf32>
    %65 = arith.addf %60, %64 : vector<16x256xf32>
    %66 = vector.extract_strided_slice %0 {offsets = [0, 13], sizes = [16, 256], strides = [1, 1]} : vector<16x287xf32> to vector<16x256xf32>
    %67 = vector.extract_strided_slice %1 {offsets = [0, 13], sizes = [16, 1], strides = [1, 1]} : vector<16x32xf32> to vector<16x1xf32>
    %68 = vector.broadcast %67 : vector<16x1xf32> to vector<16x256xf32>
    %69 = arith.mulf %66, %68 : vector<16x256xf32>
    %70 = arith.addf %65, %69 : vector<16x256xf32>
    %71 = vector.extract_strided_slice %0 {offsets = [0, 14], sizes = [16, 256], strides = [1, 1]} : vector<16x287xf32> to vector<16x256xf32>
    %72 = vector.extract_strided_slice %1 {offsets = [0, 14], sizes = [16, 1], strides = [1, 1]} : vector<16x32xf32> to vector<16x1xf32>
    %73 = vector.broadcast %72 : vector<16x1xf32> to vector<16x256xf32>
    %74 = arith.mulf %71, %73 : vector<16x256xf32>
    %75 = arith.addf %70, %74 : vector<16x256xf32>
    %76 = vector.extract_strided_slice %0 {offsets = [0, 15], sizes = [16, 256], strides = [1, 1]} : vector<16x287xf32> to vector<16x256xf32>
    %77 = vector.extract_strided_slice %1 {offsets = [0, 15], sizes = [16, 1], strides = [1, 1]} : vector<16x32xf32> to vector<16x1xf32>
    %78 = vector.broadcast %77 : vector<16x1xf32> to vector<16x256xf32>
    %79 = arith.mulf %76, %78 : vector<16x256xf32>
    %80 = arith.addf %75, %79 : vector<16x256xf32>
    %81 = vector.extract_strided_slice %0 {offsets = [0, 16], sizes = [16, 256], strides = [1, 1]} : vector<16x287xf32> to vector<16x256xf32>
    %82 = vector.extract_strided_slice %1 {offsets = [0, 16], sizes = [16, 1], strides = [1, 1]} : vector<16x32xf32> to vector<16x1xf32>
    %83 = vector.broadcast %82 : vector<16x1xf32> to vector<16x256xf32>
    %84 = arith.mulf %81, %83 : vector<16x256xf32>
    %85 = arith.addf %80, %84 : vector<16x256xf32>
    %86 = vector.extract_strided_slice %0 {offsets = [0, 17], sizes = [16, 256], strides = [1, 1]} : vector<16x287xf32> to vector<16x256xf32>
    %87 = vector.extract_strided_slice %1 {offsets = [0, 17], sizes = [16, 1], strides = [1, 1]} : vector<16x32xf32> to vector<16x1xf32>
    %88 = vector.broadcast %87 : vector<16x1xf32> to vector<16x256xf32>
    %89 = arith.mulf %86, %88 : vector<16x256xf32>
    %90 = arith.addf %85, %89 : vector<16x256xf32>
    %91 = vector.extract_strided_slice %0 {offsets = [0, 18], sizes = [16, 256], strides = [1, 1]} : vector<16x287xf32> to vector<16x256xf32>
    %92 = vector.extract_strided_slice %1 {offsets = [0, 18], sizes = [16, 1], strides = [1, 1]} : vector<16x32xf32> to vector<16x1xf32>
    %93 = vector.broadcast %92 : vector<16x1xf32> to vector<16x256xf32>
    %94 = arith.mulf %91, %93 : vector<16x256xf32>
    %95 = arith.addf %90, %94 : vector<16x256xf32>
    %96 = vector.extract_strided_slice %0 {offsets = [0, 19], sizes = [16, 256], strides = [1, 1]} : vector<16x287xf32> to vector<16x256xf32>
    %97 = vector.extract_strided_slice %1 {offsets = [0, 19], sizes = [16, 1], strides = [1, 1]} : vector<16x32xf32> to vector<16x1xf32>
    %98 = vector.broadcast %97 : vector<16x1xf32> to vector<16x256xf32>
    %99 = arith.mulf %96, %98 : vector<16x256xf32>
    %100 = arith.addf %95, %99 : vector<16x256xf32>
    %101 = vector.extract_strided_slice %0 {offsets = [0, 20], sizes = [16, 256], strides = [1, 1]} : vector<16x287xf32> to vector<16x256xf32>
    %102 = vector.extract_strided_slice %1 {offsets = [0, 20], sizes = [16, 1], strides = [1, 1]} : vector<16x32xf32> to vector<16x1xf32>
    %103 = vector.broadcast %102 : vector<16x1xf32> to vector<16x256xf32>
    %104 = arith.mulf %101, %103 : vector<16x256xf32>
    %105 = arith.addf %100, %104 : vector<16x256xf32>
    %106 = vector.extract_strided_slice %0 {offsets = [0, 21], sizes = [16, 256], strides = [1, 1]} : vector<16x287xf32> to vector<16x256xf32>
    %107 = vector.extract_strided_slice %1 {offsets = [0, 21], sizes = [16, 1], strides = [1, 1]} : vector<16x32xf32> to vector<16x1xf32>
    %108 = vector.broadcast %107 : vector<16x1xf32> to vector<16x256xf32>
    %109 = arith.mulf %106, %108 : vector<16x256xf32>
    %110 = arith.addf %105, %109 : vector<16x256xf32>
    %111 = vector.extract_strided_slice %0 {offsets = [0, 22], sizes = [16, 256], strides = [1, 1]} : vector<16x287xf32> to vector<16x256xf32>
    %112 = vector.extract_strided_slice %1 {offsets = [0, 22], sizes = [16, 1], strides = [1, 1]} : vector<16x32xf32> to vector<16x1xf32>
    %113 = vector.broadcast %112 : vector<16x1xf32> to vector<16x256xf32>
    %114 = arith.mulf %111, %113 : vector<16x256xf32>
    %115 = arith.addf %110, %114 : vector<16x256xf32>
    %116 = vector.extract_strided_slice %0 {offsets = [0, 23], sizes = [16, 256], strides = [1, 1]} : vector<16x287xf32> to vector<16x256xf32>
    %117 = vector.extract_strided_slice %1 {offsets = [0, 23], sizes = [16, 1], strides = [1, 1]} : vector<16x32xf32> to vector<16x1xf32>
    %118 = vector.broadcast %117 : vector<16x1xf32> to vector<16x256xf32>
    %119 = arith.mulf %116, %118 : vector<16x256xf32>
    %120 = arith.addf %115, %119 : vector<16x256xf32>
    %121 = vector.extract_strided_slice %0 {offsets = [0, 24], sizes = [16, 256], strides = [1, 1]} : vector<16x287xf32> to vector<16x256xf32>
    %122 = vector.extract_strided_slice %1 {offsets = [0, 24], sizes = [16, 1], strides = [1, 1]} : vector<16x32xf32> to vector<16x1xf32>
    %123 = vector.broadcast %122 : vector<16x1xf32> to vector<16x256xf32>
    %124 = arith.mulf %121, %123 : vector<16x256xf32>
    %125 = arith.addf %120, %124 : vector<16x256xf32>
    %126 = vector.extract_strided_slice %0 {offsets = [0, 25], sizes = [16, 256], strides = [1, 1]} : vector<16x287xf32> to vector<16x256xf32>
    %127 = vector.extract_strided_slice %1 {offsets = [0, 25], sizes = [16, 1], strides = [1, 1]} : vector<16x32xf32> to vector<16x1xf32>
    %128 = vector.broadcast %127 : vector<16x1xf32> to vector<16x256xf32>
    %129 = arith.mulf %126, %128 : vector<16x256xf32>
    %130 = arith.addf %125, %129 : vector<16x256xf32>
    %131 = vector.extract_strided_slice %0 {offsets = [0, 26], sizes = [16, 256], strides = [1, 1]} : vector<16x287xf32> to vector<16x256xf32>
    %132 = vector.extract_strided_slice %1 {offsets = [0, 26], sizes = [16, 1], strides = [1, 1]} : vector<16x32xf32> to vector<16x1xf32>
    %133 = vector.broadcast %132 : vector<16x1xf32> to vector<16x256xf32>
    %134 = arith.mulf %131, %133 : vector<16x256xf32>
    %135 = arith.addf %130, %134 : vector<16x256xf32>
    %136 = vector.extract_strided_slice %0 {offsets = [0, 27], sizes = [16, 256], strides = [1, 1]} : vector<16x287xf32> to vector<16x256xf32>
    %137 = vector.extract_strided_slice %1 {offsets = [0, 27], sizes = [16, 1], strides = [1, 1]} : vector<16x32xf32> to vector<16x1xf32>
    %138 = vector.broadcast %137 : vector<16x1xf32> to vector<16x256xf32>
    %139 = arith.mulf %136, %138 : vector<16x256xf32>
    %140 = arith.addf %135, %139 : vector<16x256xf32>
    %141 = vector.extract_strided_slice %0 {offsets = [0, 28], sizes = [16, 256], strides = [1, 1]} : vector<16x287xf32> to vector<16x256xf32>
    %142 = vector.extract_strided_slice %1 {offsets = [0, 28], sizes = [16, 1], strides = [1, 1]} : vector<16x32xf32> to vector<16x1xf32>
    %143 = vector.broadcast %142 : vector<16x1xf32> to vector<16x256xf32>
    %144 = arith.mulf %141, %143 : vector<16x256xf32>
    %145 = arith.addf %140, %144 : vector<16x256xf32>
    %146 = vector.extract_strided_slice %0 {offsets = [0, 29], sizes = [16, 256], strides = [1, 1]} : vector<16x287xf32> to vector<16x256xf32>
    %147 = vector.extract_strided_slice %1 {offsets = [0, 29], sizes = [16, 1], strides = [1, 1]} : vector<16x32xf32> to vector<16x1xf32>
    %148 = vector.broadcast %147 : vector<16x1xf32> to vector<16x256xf32>
    %149 = arith.mulf %146, %148 : vector<16x256xf32>
    %150 = arith.addf %145, %149 : vector<16x256xf32>
    %151 = vector.extract_strided_slice %0 {offsets = [0, 30], sizes = [16, 256], strides = [1, 1]} : vector<16x287xf32> to vector<16x256xf32>
    %152 = vector.extract_strided_slice %1 {offsets = [0, 30], sizes = [16, 1], strides = [1, 1]} : vector<16x32xf32> to vector<16x1xf32>
    %153 = vector.broadcast %152 : vector<16x1xf32> to vector<16x256xf32>
    %154 = arith.mulf %151, %153 : vector<16x256xf32>
    %155 = arith.addf %150, %154 : vector<16x256xf32>
    %156 = vector.extract_strided_slice %0 {offsets = [0, 31], sizes = [16, 256], strides = [1, 1]} : vector<16x287xf32> to vector<16x256xf32>
    %157 = vector.extract_strided_slice %1 {offsets = [0, 31], sizes = [16, 1], strides = [1, 1]} : vector<16x32xf32> to vector<16x1xf32>
    %158 = vector.broadcast %157 : vector<16x1xf32> to vector<16x256xf32>
    %159 = arith.mulf %156, %158 : vector<16x256xf32>
    %160 = arith.addf %155, %159 : vector<16x256xf32>
    %c0_3 = arith.constant 0 : index
    %c0_4 = arith.constant 0 : index
    %161 = vector.load %arg4[%c0_3, %c0_4] : memref<16x16xf32, #tpu.memory_space<vmem>>, vector<16x16xf32>
    %cst = arith.constant dense<0.000000e+00> : vector<16x256xf32>
    %162 = tpu.matmul %161, %160, %cst {dimension_numbers = #tpu.dot_dimension_numbers<[1], [0], [0], [1], [0, 0, 1, 1], [], []>} : vector<16x16xf32>, vector<16x256xf32>, vector<16x256xf32> -> vector<16x256xf32>
    %c0_5 = arith.constant 0 : index
    %c0_6 = arith.constant 0 : index
    %163 = vector.load %arg2[%c0_5, %c0_6] : memref<1x256xf32, #tpu.memory_space<vmem>>, vector<1x256xf32>
    %164 = vector.broadcast %163 : vector<1x256xf32> to vector<16x256xf32>
    %165 = arith.mulf %162, %164 : vector<16x256xf32>
    %cst_7 = arith.constant dense<0.000000e+00> : vector<16xf32>
    %166 = vector.multi_reduction <add>, %165, %cst_7 [1] : vector<16x256xf32> to vector<16xf32>
    %167 = vector.shape_cast %166 : vector<16xf32> to vector<16x1xf32>
    %168 = arith.mulf %165, %165 : vector<16x256xf32>
    %cst_8 = arith.constant dense<0.000000e+00> : vector<16xf32>
    %169 = vector.multi_reduction <add>, %168, %cst_8 [1] : vector<16x256xf32> to vector<16xf32>
    %170 = vector.shape_cast %169 : vector<16xf32> to vector<16x1xf32>
    %cst_9 = arith.constant 0.00515463902 : f32
    %171 = vector.broadcast %cst_9 : f32 to vector<16x1xf32>
    %172 = arith.mulf %167, %171 : vector<16x1xf32>
    %cst_10 = arith.constant 0.00515463902 : f32
    %173 = vector.broadcast %cst_10 : f32 to vector<16x1xf32>
    %174 = arith.mulf %170, %173 : vector<16x1xf32>
    %175 = arith.mulf %172, %172 : vector<16x1xf32>
    %176 = arith.subf %174, %175 : vector<16x1xf32>
    %c0_11 = arith.constant 0 : index
    %c0_12 = arith.constant 0 : index
    %177 = vector.load %arg5[%c0_11, %c0_12] : memref<16x1xf32, #tpu.memory_space<vmem>>, vector<16x1xf32>
    %cst_13 = arith.constant 9.99999974E-6 : f32
    %178 = vector.broadcast %cst_13 : f32 to vector<16x1xf32>
    %179 = arith.addf %176, %178 : vector<16x1xf32>
    %180 = math.rsqrt %179 : vector<16x1xf32>
    %181 = arith.mulf %177, %180 : vector<16x1xf32>
    %c0_14 = arith.constant 0 : index
    %c0_15 = arith.constant 0 : index
    %182 = vector.load %arg6[%c0_14, %c0_15] : memref<16x1xf32, #tpu.memory_space<vmem>>, vector<16x1xf32>
    %183 = arith.mulf %172, %181 : vector<16x1xf32>
    %184 = arith.subf %182, %183 : vector<16x1xf32>
    %185 = vector.broadcast %181 : vector<16x1xf32> to vector<16x256xf32>
    %186 = arith.mulf %162, %185 : vector<16x256xf32>
    %187 = vector.broadcast %184 : vector<16x1xf32> to vector<16x256xf32>
    %188 = arith.addf %186, %187 : vector<16x256xf32>
    %c0_16 = arith.constant 0 : index
    %c0_17 = arith.constant 0 : index
    %189 = vector.load %arg7[%c0_16, %c0_17] : memref<16x256xf32, #tpu.memory_space<vmem>>, vector<16x256xf32>
    tpu.vector_store %arg7[%c0_16, %c0_17], %188 {strides = array<i32>} : memref<16x256xf32, #tpu.memory_space<vmem>>, vector<16x256xf32>,
    return
  }
  func.func @transform_0(%arg0: i32) -> (i32, i32) {
    %c0_i32 = arith.constant 0 : i32
    %c0_i32_0 = arith.constant 0 : i32
    %c0_i32_1 = arith.constant 0 : i32
    return %c0_i32, %c0_i32_0 : i32, i32
  }
  func.func @transform_1(%arg0: i32) -> (i32, i32) {
    %c0_i32 = arith.constant 0 : i32
    %c0_i32_0 = arith.constant 0 : i32
    %c0_i32_1 = arith.constant 0 : i32
    return %c0_i32, %c0_i32_0 : i32, i32
  }
  func.func @transform_2(%arg0: i32) -> (i32, i32) {
    %c0_i32 = arith.constant 0 : i32
    %c0_i32_0 = arith.constant 0 : i32
    %c0_i32_1 = arith.constant 0 : i32
    return %c0_i32, %c0_i32_0 : i32, i32
  }
  func.func @transform_3(%arg0: i32) -> (i32, i32) {
    %c0_i32 = arith.constant 0 : i32
    %c0_i32_0 = arith.constant 0 : i32
    %c0_i32_1 = arith.constant 0 : i32
    return %c0_i32, %c0_i32_0 : i32, i32
  }
  func.func @transform_4(%arg0: i32) -> (i32, i32) {
    %c0_i32 = arith.constant 0 : i32
    %c0_i32_0 = arith.constant 0 : i32
    %c0_i32_1 = arith.constant 0 : i32
    return %c0_i32, %c0_i32_0 : i32, i32
  }
  func.func @transform_5(%arg0: i32) -> (i32, i32) {
    %c0_i32 = arith.constant 0 : i32
    %c0_i32_0 = arith.constant 0 : i32
    %c0_i32_1 = arith.constant 0 : i32
    return %c0_i32, %c0_i32_0 : i32, i32
  }
  func.func @transform_6(%arg0: i32) -> (i32, i32) {
    %c0_i32 = arith.constant 0 : i32
    %c0_i32_0 = arith.constant 0 : i32
    %c0_i32_1 = arith.constant 0 : i32
    return %c0_i32, %c0_i32_0 : i32, i32
  }
}

</mosaic_0001>

<bundles_post_ra>
// kernel: tpu_custom_call.1
= control target key start
LH: loop header
LB: loop body
LE: loop exit
PB: predicated region body
PF: predicated region fallthrough
CT: control target
= control target key end

     0   :  { %11 = vsyncpa [#allocation3], 0  ;;  %s2903_s0 = inlined_call_operand.hbm [shape: f32[16,287], index: 0, kind: input, shape index: {}]   ;;  %s2904_s1 = inlined_call_operand.hbm [shape: f32[1,256], index: 1, kind: input, shape index: {}]   ;;  %s2905_s2 = inlined_call_operand.vmem [shape: f32[16,32], index: 2, kind: input, shape index: {}]   ;;  %s2906_s3 = inlined_call_operand.vmem [shape: f32[16,16], index: 3, kind: input, shape index: {}]   ;;  %s2907_s4 = inlined_call_operand.vmem [shape: f32[16,1], index: 4, kind: input, shape index: {}]   ;;  %s2908_s5 = inlined_call_operand.vmem [shape: f32[16,1], index: 5, kind: input, shape index: {}]   ;;  %s2909_s6 = inlined_call_operand.hbm [shape: f32[16,256], index: 6, kind: output, shape index: {}]  }
   0x1   :  { %12 = vsyncpa [#allocation6], 0 }
   0x2   :  { %13 = vsyncpa [#allocation4], 0  ;;  %s18_s23 = sshll.u32 %s2903_s0, 4  ;;  %s1876_s24 = smov [#allocation2]   ;;  %s19_s23 = int_to_ptr.hbm [resolvable:$true] %s18_s23 }
   0x3   :  { %s20_s25 = sshll.u32 %s1876_s24, 4  ;;  %s32_s28 = sshll.u32 %s2904_s1, 4  ;;  %s21_s25 = int_to_ptr.vmem [resolvable:$true] %s20_s25  ;;  %s33_s28 = int_to_ptr.hbm [resolvable:$true] %s32_s28 }
   0x4   :  { %s1877_s29 = smov 384   ;;  %s1878_s30 = smov 24  }
   0x5   :  { %26 = dma.hbm_to_vmem [thread:$0]  %s19_s23, 768, %s21_s25, [#allocation3], %s1877_s29, %s1877_s29, %s1878_s30  }
   0x6   :  { %s1879_s7 = smov [#allocation5]  }
   0x7   :  { %s34_s8 = sshll.u32 %s1879_s7, 4  ;;  %s35_s8 = int_to_ptr.vmem [resolvable:$true] %s34_s8 }
   0x8   :  { %37 = dma.hbm_to_vmem [thread:$0]  %s33_s28, 32, %s35_s8, [#allocation6]  }
   0x9   :  { %1870 = dma.done.wait [#allocation3], 768  }
   0xa   :  { %1871 = vsyncadd [#allocation3], 4294966528 }
   0xb   :  { %1872 = dma.done.wait [#allocation6], 32  }
   0xc   :  { %1873 = vsyncadd [#allocation6], 4294967264  ;;  %v1880_v0 = vmov 1   ;;  %v1881_v1 = vmov 3   ;;  %v1882_v2 = vmov 2   ;;  %v1990_v3 = vld [vmem:[%s2905_s2] sm:$0xff] }
   0xd   :  { %1722 = vset.pattern.permute.xlu1 %v1880_v0  ;;  %1725 = vset.pattern.permute.xlu0 %v1881_v1  ;;  %v1996_v4 = vld [vmem:[%s2905_s2 + $0x8] sm:$0xff]  ;;  %v1883_v5 = vmov 4   ;;  %v1884_v6 = vmov 5   ;;  %v1885_v7 = vmov 6   ;;  %v2009_v8 = vld [vmem:[#allocation2 + $0x10] sm:$0xff]  ;;  %v2011_v9 = vld [vmem:[#allocation2] sm:$0xff] }
   0xe   :  { %1724 = vset.pattern.permute.xlu2 %v1882_v2  ;;  %77 = vperm.xlu1 %1722, %v1990_v3   ;;  %s1886_s11 = smov 127   ;;  %v2015_v13 = vld [vmem:[#allocation2 + $0x18] sm:$0xff]  ;;  %v2017_v14 = vld [vmem:[#allocation2 + $0x28] sm:$0xff]  ;;  %v2024_v20 = vld [vmem:[#allocation2 + $0x20] sm:$0xff]  ;;  %s1887_s12 = smov 126   ;;  %v1888_v31 = vmov 7  }
   0xf   :  { %167 = vperm.xlu0 %1725, %v1990_v3   ;;  %126 = vperm.xlu2 %1724, %v1996_v4   ;;  %v2019_v15 = vld [vmem:[#allocation2 + $0x8] sm:$0xff]  ;;  %s1889_s13 = smov 125   ;;  %s1890_s14 = smov 124   ;;  %vm783_vm0 = vcmask 916480   ;;  %vm828_vm1 = vcmask 908288   ;;  %vm873_vm2 = vcmask 900096  }
  0x10   :  { %s1891_s15 = smov 123   ;;  %s1892_s16 = smov 122   ;;  %vm918_vm3 = vcmask 891904   ;;  %vm963_vm4 = vcmask 883712   ;;  %vm1008_vm5 = vcmask 875520   ;;  %vm108_vm6 = vcmask 1039360  }
  0x11   :  { %s1893_s17 = smov 121   ;;  %s1896_s18 = smov 120   ;;  %vm153_vm7 = vcmask 1031168   ;;  %vm198_vm8 = vcmask 1022976   ;;  %vm243_vm9 = vcmask 1014784   ;;  %vm288_vm10 = vcmask 1006592  }
  0x12   :  { %s1898_s19 = smov 119   ;;  %s1900_s20 = smov 118   ;;  %vm333_vm11 = vcmask 998400   ;;  %vm378_vm12 = vcmask 990208   ;;  %vm423_vm13 = vcmask 982016   ;;  %vm468_vm14 = vcmask 973824  }
  0x13   :  { %s1902_s21 = smov 117   ;;  %s1904_s22 = smov 116   ;;  %vm513_vm15 = vcmask 965632  }
  0x14   :  { %s1906_s23 = smov 115   ;;  %s1908_s24 = smov 114  }
  0x15   :  { %s1910_s25 = smov 113   ;;  %s1912_s26 = smov 112  }
  0x16   :  { %81 = vperm.xlu1 %1722, %v1996_v4   ;;  %s1914_s27 = smov 111   ;;  %s1916_s28 = smov 110  }
  0x17   :  { %1727 = vset.pattern.permute.xlu0 %v1883_v5  ;;  %s1918_s29 = smov 109   ;;  %s1920_s30 = smov 108  }
  0x18   :  { %212 = vperm.xlu0 %1727, %v1990_v3   ;;  %s1933_s9 = smov 106   ;;  %s1934_s10 = smov 105  }
  0x19   :  { %s1630_s0 = sshll.u32 %s2909_s6, 4  ;;  %s1945_s1 = smov 16   ;;  %s1631_s0 = int_to_ptr.hbm [resolvable:$true] %s1630_s0 }
  0x1e   :  { %1723 = vset.pattern.permute.xlu1 %v1882_v2 }
  0x1f   :  { %122 = vperm.xlu1 %1723, %v1990_v3  }
  0x20   :  { %1729 = vset.pattern.permute.xlu0 %v1884_v6 }
  0x21   :  { %257 = vperm.xlu0 %1729, %v1990_v3  }
  0x27   :  { %1726 = vset.pattern.permute.xlu1 %v1881_v1 }
  0x28   :  { %171 = vperm.xlu1 %1726, %v1996_v4  }
  0x29   :  { %1731 = vset.pattern.permute.xlu0 %v1885_v7 }
  0x2a   :  { %302 = vperm.xlu0 %1731, %v1990_v3  }
  0x30   :  { %1728 = vset.pattern.permute.xlu1 %v1883_v5 }
  0x31   :  { %216 = vperm.xlu1 %1728, %v1996_v4  }
  0x32   :  { %1733 = vset.pattern.permute.xlu0 %v1888_v31 }
  0x39   :  { %1730 = vset.pattern.permute.xlu1 %v1884_v6 }
  0x3a   :  { %261 = vperm.xlu1 %1730, %v1996_v4  }
  0x42   :  { %1732 = vset.pattern.permute.xlu1 %v1885_v7 }
  0x43   :  { %306 = vperm.xlu1 %1732, %v1996_v4  }
  0x4b   :  { %1734 = vset.pattern.permute.xlu1 %v1888_v31 }
  0x69   :  { %v127_v25 = vpop.permute.xlu2 %126 }
  0x6a   :  { %v133_v26 = vmul.f32 %v127_v25, %v2024_v20  ;;  %v132_v27 = vmul.f32 %v127_v25, %v2015_v13  ;;  %v134_v34 = vmul.f32 %v127_v25, %v2017_v14 }
  0x80   :  { %v78_v10 = vpop.permute.xlu1 %77 }
  0x81   :  { %v86_v11 = vmul.f32 %v78_v10, %v2009_v8  ;;  %v84_v12 = vmul.f32 %v78_v10, %v2011_v9  ;;  %v85_v19 = vmul.f32 %v78_v10, %v2019_v15  ;;  %v168_v30 = vpop.permute.xlu0 %167 }
  0x82   :  { %v175_v32 = vmul.f32 %v168_v30, %v2019_v15  ;;  %v174_v38 = vmul.f32 %v168_v30, %v2011_v9  ;;  %v176_v43 = vmul.f32 %v168_v30, %v2009_v8 }
  0x83   :  { %100 = vrot.lane.b32.xlu0 %v86_v11, %s1886_s11  ;;  %96 = vrot.lane.b32.xlu2 %v84_v12, %s1886_s11 }
  0x88   :  { %v82_v16 = vpop.permute.xlu1 %81 }
  0x89   :  { %v87_v17 = vmul.f32 %v82_v16, %v2015_v13  ;;  %v89_v18 = vmul.f32 %v82_v16, %v2017_v14  ;;  %v88_v22 = vmul.f32 %v82_v16, %v2024_v20 }
  0x8a   :  { %v213_v40 = vpop.permute.xlu0 %212 }
  0x8b   :  { %102 = vrot.lane.b32.xlu1 %v87_v17, %s1886_s11  ;;  %106 = vrot.lane.b32.xlu0 %v89_v18, %s1886_s11  ;;  %v220_v41 = vmul.f32 %v213_v40, %v2019_v15  ;;  %v219_v50 = vmul.f32 %v213_v40, %v2011_v9  ;;  %v221_v52 = vmul.f32 %v213_v40, %v2009_v8 }
  0x8c   :  { %98 = vrot.lane.b32.xlu2 %v85_v19, %s1886_s11 }
  0x91   :  { %v123_v21 = vpop.permute.xlu1 %122 }
  0x92   :  { %v130_v23 = vmul.f32 %v123_v21, %v2019_v15  ;;  %v129_v24 = vmul.f32 %v123_v21, %v2011_v9  ;;  %v131_v28 = vmul.f32 %v123_v21, %v2009_v8 }
  0x93   :  { %v258_v48 = vpop.permute.xlu0 %257 }
  0x94   :  { %104 = vrot.lane.b32.xlu2 %v88_v22, %s1886_s11  ;;  %143 = vrot.lane.b32.xlu1 %v130_v23, %s1887_s12  ;;  %v265_v49 = vmul.f32 %v258_v48, %v2019_v15  ;;  %v264_v56 = vmul.f32 %v258_v48, %v2011_v9  ;;  %v266_v58 = vmul.f32 %v258_v48, %v2009_v8  ;;  %s1935_s11 = smov 104  }
  0x95   :  { %141 = vrot.lane.b32.xlu0 %v129_v24, %s1887_s12 }
  0x9a   :  { %v172_v29 = vpop.permute.xlu1 %171 }
  0x9b   :  { %v177_v33 = vmul.f32 %v172_v29, %v2015_v13  ;;  %v178_v36 = vmul.f32 %v172_v29, %v2024_v20  ;;  %v179_v47 = vmul.f32 %v172_v29, %v2017_v14 }
  0x9c   :  { %145 = vrot.lane.b32.xlu2 %v131_v28, %s1887_s12  ;;  %149 = vrot.lane.b32.xlu1 %v133_v26, %s1887_s12  ;;  %v303_v53 = vpop.permute.xlu0 %302  ;;  %v1894_v28 = vmov 8  }
  0x9d   :  { %147 = vrot.lane.b32.xlu0 %v132_v27, %s1887_s12  ;;  %v310_v54 = vmul.f32 %v303_v53, %v2019_v15  ;;  %v309_v60 = vmul.f32 %v303_v53, %v2011_v9  ;;  %v311_v62 = vmul.f32 %v303_v53, %v2009_v8 }
  0xa3   :  { %v217_v35 = vpop.permute.xlu1 %216 }
  0xa4   :  { %151 = vrot.lane.b32.xlu2 %v134_v34, %s1887_s12  ;;  %188 = vrot.lane.b32.xlu1 %v175_v32, %s1889_s13  ;;  %v222_v37 = vmul.f32 %v217_v35, %v2015_v13  ;;  %v223_v45 = vmul.f32 %v217_v35, %v2024_v20  ;;  %v224_v55 = vmul.f32 %v217_v35, %v2017_v14  ;;  %v1895_v35 = vmov 9   ;;  %s1936_s12 = smov 103  }
  0xa5   :  { %192 = vrot.lane.b32.xlu0 %v177_v33, %s1889_s13 }
  0xac   :  { %186 = vrot.lane.b32.xlu2 %v174_v38, %s1889_s13  ;;  %194 = vrot.lane.b32.xlu1 %v178_v36, %s1889_s13  ;;  %v262_v39 = vpop.permute.xlu1 %261 }
  0xad   :  { %237 = vrot.lane.b32.xlu0 %v222_v37, %s1890_s14  ;;  %v267_v42 = vmul.f32 %v262_v39, %v2015_v13  ;;  %v268_v51 = vmul.f32 %v262_v39, %v2024_v20  ;;  %v269_v59 = vmul.f32 %v262_v39, %v2017_v14 }
  0xb4   :  { %190 = vrot.lane.b32.xlu2 %v176_v43, %s1889_s13  ;;  %233 = vrot.lane.b32.xlu1 %v220_v41, %s1890_s14 }
  0xb5   :  { %282 = vrot.lane.b32.xlu0 %v267_v42, %s1891_s15  ;;  %v307_v44 = vpop.permute.xlu1 %306 }
  0xb6   :  { %v312_v46 = vmul.f32 %v307_v44, %v2015_v13  ;;  %v313_v57 = vmul.f32 %v307_v44, %v2024_v20  ;;  %v314_v1 = vmul.f32 %v307_v44, %v2017_v14 }
  0xbc   :  { %196 = vrot.lane.b32.xlu2 %v179_v47, %s1889_s13  ;;  %239 = vrot.lane.b32.xlu1 %v223_v45, %s1890_s14  ;;  %v1897_v47 = vmov 10   ;;  %s1937_s13 = smov 102  }
  0xbd   :  { %327 = vrot.lane.b32.xlu0 %v312_v46, %s1892_s16 }
  0xc4   :  { %231 = vrot.lane.b32.xlu2 %v219_v50, %s1890_s14  ;;  %278 = vrot.lane.b32.xlu1 %v265_v49, %s1891_s15 }
  0xc5   :  { %347 = vperm.xlu0 %1733, %v1990_v3  }
  0xcc   :  { %235 = vrot.lane.b32.xlu2 %v221_v52, %s1890_s14  ;;  %284 = vrot.lane.b32.xlu1 %v268_v51, %s1891_s15 }
  0xcd   :  { %1735 = vset.pattern.permute.xlu0 %v1894_v28 }
  0xd4   :  { %241 = vrot.lane.b32.xlu2 %v224_v55, %s1890_s14  ;;  %323 = vrot.lane.b32.xlu1 %v310_v54, %s1892_s16  ;;  %s1938_s14 = smov 101  }
  0xdc   :  { %276 = vrot.lane.b32.xlu2 %v264_v56, %s1891_s15  ;;  %329 = vrot.lane.b32.xlu1 %v313_v57, %s1892_s16 }
  0xe4   :  { %280 = vrot.lane.b32.xlu2 %v266_v58, %s1891_s15  ;;  %351 = vperm.xlu1 %1734, %v1996_v4  }
  0xec   :  { %286 = vrot.lane.b32.xlu2 %v269_v59, %s1891_s15  ;;  %1736 = vset.pattern.permute.xlu1 %v1894_v28  ;;  %v1899_v59 = vmov 11   ;;  %s1939_s15 = smov 100  }
  0xf4   :  { %321 = vrot.lane.b32.xlu2 %v309_v60, %s1892_s16 }
  0xf5   :  { %v2073_v61 = vpop.permute.xlu0 %100 }
  0xfc   :  { %325 = vrot.lane.b32.xlu2 %v311_v62, %s1892_s16 }
  0xfd   :  { %v2077_v63 = vpop.permute.xlu1 %102  ;;  %v2079_v0 = vpop.permute.xlu0 %106 }
 0x104   :  { %331 = vrot.lane.b32.xlu2 %v314_v1, %s1892_s16  ;;  %s1940_s16 = smov 99  }
 0x106   :  { %v2083_v2 = vpop.permute.xlu1 %143 }
 0x107   :  { %v2085_v5 = vpop.permute.xlu0 %141 }
 0x10e   :  { %v2087_v6 = vpop.permute.xlu1 %149 }
 0x10f   :  { %v2089_v7 = vpop.permute.xlu0 %147 }
 0x116   :  { %v2091_v10 = vpop.permute.xlu1 %188 }
 0x117   :  { %v2093_v11 = vpop.permute.xlu0 %192 }
 0x11e   :  { %v2095_v12 = vpop.permute.xlu1 %194 }
 0x11f   :  { %v2097_v16 = vpop.permute.xlu0 %237 }
 0x126   :  { %v2099_v17 = vpop.permute.xlu1 %233 }
 0x127   :  { %v2101_v18 = vpop.permute.xlu0 %282 }
 0x12e   :  { %v2103_v19 = vpop.permute.xlu1 %239 }
 0x12f   :  { %v2105_v21 = vpop.permute.xlu0 %327 }
 0x136   :  { %v2107_v22 = vpop.permute.xlu1 %278 }
 0x137   :  { %v348_v23 = vpop.permute.xlu0 %347 }
 0x138   :  { %v355_v24 = vmul.f32 %v348_v23, %v2019_v15  ;;  %v354_v25 = vmul.f32 %v348_v23, %v2011_v9  ;;  %v356_v27 = vmul.f32 %v348_v23, %v2009_v8 }
 0x13a   :  { %368 = vrot.lane.b32.xlu1 %v355_v24, %s1893_s17  ;;  %366 = vrot.lane.b32.xlu2 %v354_v25, %s1893_s17 }
 0x13e   :  { %v2111_v26 = vpop.permute.xlu1 %284 }
 0x142   :  { %370 = vrot.lane.b32.xlu2 %v356_v27, %s1893_s17 }
 0x146   :  { %v2114_v29 = vpop.permute.xlu1 %323 }
 0x14e   :  { %v2116_v30 = vpop.permute.xlu1 %329 }
 0x156   :  { %v352_v31 = vpop.permute.xlu1 %351 }
 0x157   :  { %v357_v32 = vmul.f32 %v352_v31, %v2015_v13  ;;  %v358_v33 = vmul.f32 %v352_v31, %v2024_v20  ;;  %v359_v34 = vmul.f32 %v352_v31, %v2017_v14 }
 0x159   :  { %372 = vrot.lane.b32.xlu0 %v357_v32, %s1893_s17  ;;  %374 = vrot.lane.b32.xlu1 %v358_v33, %s1893_s17 }
 0x15a   :  { %376 = vrot.lane.b32.xlu2 %v359_v34, %s1893_s17  ;;  %v1901_v34 = vmov 12   ;;  %s1941_s17 = smov 98  }
 0x161   :  { %392 = vperm.xlu0 %1735, %v1990_v3   ;;  %396 = vperm.xlu1 %1736, %v1996_v4  }
 0x169   :  { %1737 = vset.pattern.permute.xlu0 %v1895_v35  ;;  %1738 = vset.pattern.permute.xlu1 %v1895_v35 }
 0x1ac   :  { %v2123_v36 = vpop.permute.xlu1 %368 }
 0x1cb   :  { %v2125_v37 = vpop.permute.xlu1 %374  ;;  %v2127_v38 = vpop.permute.xlu0 %372 }
 0x1d3   :  { %v397_v39 = vpop.permute.xlu1 %396  ;;  %v393_v40 = vpop.permute.xlu0 %392 }
 0x1d4   :  { %v402_v41 = vmul.f32 %v397_v39, %v2015_v13  ;;  %v400_v42 = vmul.f32 %v393_v40, %v2019_v15  ;;  %v399_v43 = vmul.f32 %v393_v40, %v2011_v9  ;;  %v403_v44 = vmul.f32 %v397_v39, %v2024_v20 }
 0x1d5   :  { %v401_v45 = vmul.f32 %v393_v40, %v2009_v8  ;;  %v404_v46 = vmul.f32 %v397_v39, %v2017_v14 }
 0x1d6   :  { %417 = vrot.lane.b32.xlu0 %v402_v41, %s1896_s18  ;;  %413 = vrot.lane.b32.xlu1 %v400_v42, %s1896_s18 }
 0x1d7   :  { %411 = vrot.lane.b32.xlu2 %v399_v43, %s1896_s18 }
 0x1de   :  { %437 = vperm.xlu0 %1737, %v1990_v3   ;;  %419 = vrot.lane.b32.xlu1 %v403_v44, %s1896_s18 }
 0x1df   :  { %415 = vrot.lane.b32.xlu2 %v401_v45, %s1896_s18 }
 0x1e6   :  { %441 = vperm.xlu1 %1738, %v1996_v4   ;;  %1739 = vset.pattern.permute.xlu0 %v1897_v47 }
 0x1e7   :  { %421 = vrot.lane.b32.xlu2 %v404_v46, %s1896_s18  ;;  %s1942_s18 = smov 97  }
 0x1ee   :  { %1740 = vset.pattern.permute.xlu1 %v1897_v47 }
 0x248   :  { %v2137_v48 = vpop.permute.xlu1 %413  ;;  %v2139_v49 = vpop.permute.xlu0 %417 }
 0x249   :  { %2931 = vst [vmem:[#allocation11_spill] sm:$0xff] %v2139_v49  ;;  %v1911_v49 = vmov 17  }
 0x250   :  { %v2141_v50 = vpop.permute.xlu1 %419  ;;  %v438_v51 = vpop.permute.xlu0 %437 }
 0x251   :  { %2932 = vst [vmem:[#allocation12_spill] sm:$0xff] %v2141_v50  ;;  %v445_v52 = vmul.f32 %v438_v51, %v2019_v15  ;;  %v444_v53 = vmul.f32 %v438_v51, %v2011_v9  ;;  %v446_v57 = vmul.f32 %v438_v51, %v2009_v8 }
 0x253   :  { %458 = vrot.lane.b32.xlu1 %v445_v52, %s1898_s19  ;;  %456 = vrot.lane.b32.xlu2 %v444_v53, %s1898_s19  ;;  %v1903_v52 = vmov 13  }
 0x258   :  { %v442_v54 = vpop.permute.xlu1 %441 }
 0x259   :  { %v447_v55 = vmul.f32 %v442_v54, %v2015_v13  ;;  %v448_v56 = vmul.f32 %v442_v54, %v2024_v20  ;;  %v449_v58 = vmul.f32 %v442_v54, %v2017_v14 }
 0x25b   :  { %462 = vrot.lane.b32.xlu0 %v447_v55, %s1898_s19  ;;  %464 = vrot.lane.b32.xlu1 %v448_v56, %s1898_s19 }
 0x25c   :  { %460 = vrot.lane.b32.xlu2 %v446_v57, %s1898_s19 }
 0x263   :  { %482 = vperm.xlu0 %1739, %v1990_v3   ;;  %486 = vperm.xlu1 %1740, %v1996_v4  }
 0x264   :  { %466 = vrot.lane.b32.xlu2 %v449_v58, %s1898_s19 }
 0x26b   :  { %1741 = vset.pattern.permute.xlu0 %v1899_v59  ;;  %1742 = vset.pattern.permute.xlu1 %v1899_v59 }
 0x2c5   :  { %v2151_v60 = vpop.permute.xlu1 %458 }
 0x2c6   :  { %2933 = vst [vmem:[#allocation13_spill] sm:$0xff] %v2151_v60 }
 0x2cd   :  { %v2153_v62 = vpop.permute.xlu1 %464  ;;  %v2155_v1 = vpop.permute.xlu0 %462 }
 0x2ce   :  { %2934 = vst [vmem:[#allocation14_spill] sm:$0xff] %v2153_v62 }
 0x2cf   :  { %2935 = vst [vmem:[#allocation15_spill] sm:$0xff] %v2155_v1 }
 0x2d5   :  { %v487_v23 = vpop.permute.xlu1 %486  ;;  %v483_v24 = vpop.permute.xlu0 %482 }
 0x2d6   :  { %v492_v25 = vmul.f32 %v487_v23, %v2015_v13  ;;  %v490_v27 = vmul.f32 %v483_v24, %v2019_v15  ;;  %v489_v28 = vmul.f32 %v483_v24, %v2011_v9  ;;  %v493_v31 = vmul.f32 %v487_v23, %v2024_v20 }
 0x2d7   :  { %v491_v32 = vmul.f32 %v483_v24, %v2009_v8  ;;  %v494_v33 = vmul.f32 %v487_v23, %v2017_v14 }
 0x2d8   :  { %507 = vrot.lane.b32.xlu0 %v492_v25, %s1900_s20  ;;  %503 = vrot.lane.b32.xlu1 %v490_v27, %s1900_s20 }
 0x2d9   :  { %501 = vrot.lane.b32.xlu2 %v489_v28, %s1900_s20  ;;  %v1905_v28 = vmov 14  }
 0x2e0   :  { %527 = vperm.xlu0 %1741, %v1990_v3   ;;  %509 = vrot.lane.b32.xlu1 %v493_v31, %s1900_s20 }
 0x2e1   :  { %505 = vrot.lane.b32.xlu2 %v491_v32, %s1900_s20 }
 0x2e8   :  { %531 = vperm.xlu1 %1742, %v1996_v4   ;;  %1743 = vset.pattern.permute.xlu0 %v1901_v34 }
 0x2e9   :  { %511 = vrot.lane.b32.xlu2 %v494_v33, %s1900_s20 }
 0x2f0   :  { %1744 = vset.pattern.permute.xlu1 %v1901_v34 }
 0x34a   :  { %v2165_v35 = vpop.permute.xlu1 %503  ;;  %v2167_v39 = vpop.permute.xlu0 %507 }
 0x34b   :  { %2936 = vst [vmem:[#allocation16_spill] sm:$0xff] %v2165_v35 }
 0x34c   :  { %2937 = vst [vmem:[#allocation17_spill] sm:$0xff] %v2167_v39 }
 0x352   :  { %v2169_v40 = vpop.permute.xlu1 %509  ;;  %v528_v41 = vpop.permute.xlu0 %527 }
 0x353   :  { %2938 = vst [vmem:[#allocation18_spill] sm:$0xff] %v2169_v40  ;;  %v535_v42 = vmul.f32 %v528_v41, %v2019_v15  ;;  %v534_v43 = vmul.f32 %v528_v41, %v2011_v9  ;;  %v536_v47 = vmul.f32 %v528_v41, %v2009_v8 }
 0x355   :  { %548 = vrot.lane.b32.xlu1 %v535_v42, %s1902_s21  ;;  %546 = vrot.lane.b32.xlu2 %v534_v43, %s1902_s21 }
 0x35a   :  { %v532_v44 = vpop.permute.xlu1 %531 }
 0x35b   :  { %v537_v45 = vmul.f32 %v532_v44, %v2015_v13  ;;  %v538_v46 = vmul.f32 %v532_v44, %v2024_v20  ;;  %v539_v51 = vmul.f32 %v532_v44, %v2017_v14 }
 0x35d   :  { %552 = vrot.lane.b32.xlu0 %v537_v45, %s1902_s21  ;;  %554 = vrot.lane.b32.xlu1 %v538_v46, %s1902_s21 }
 0x35e   :  { %550 = vrot.lane.b32.xlu2 %v536_v47, %s1902_s21 }
 0x365   :  { %572 = vperm.xlu0 %1743, %v1990_v3   ;;  %576 = vperm.xlu1 %1744, %v1996_v4  }
 0x366   :  { %556 = vrot.lane.b32.xlu2 %v539_v51, %s1902_s21  ;;  %v2207_v51 = vpop.permute.xlu2 %96 }
 0x36d   :  { %1745 = vset.pattern.permute.xlu0 %v1903_v52  ;;  %1746 = vset.pattern.permute.xlu1 %v1903_v52 }
 0x36e   :  { %v2209_v52 = vpop.permute.xlu2 %98 }
 0x3c7   :  { %v2179_v53 = vpop.permute.xlu1 %548 }
 0x3c8   :  { %2939 = vst [vmem:[#allocation19_spill] sm:$0xff] %v2179_v53 }
 0x3cf   :  { %v2181_v54 = vpop.permute.xlu1 %554  ;;  %v2183_v55 = vpop.permute.xlu0 %552 }
 0x3d0   :  { %2940 = vst [vmem:[#allocation20_spill] sm:$0xff] %v2181_v54 }
 0x3d1   :  { %2941 = vst [vmem:[#allocation21_spill] sm:$0xff] %v2183_v55 }
 0x3d7   :  { %v577_v56 = vpop.permute.xlu1 %576  ;;  %v573_v57 = vpop.permute.xlu0 %572 }
 0x3d8   :  { %v579_v58 = vmul.f32 %v573_v57, %v2011_v9  ;;  %v580_v59 = vmul.f32 %v573_v57, %v2019_v15  ;;  %v582_v23 = vmul.f32 %v577_v56, %v2015_v13  ;;  %v583_v24 = vmul.f32 %v577_v56, %v2024_v20 }
 0x3d9   :  { %v581_v25 = vmul.f32 %v573_v57, %v2009_v8  ;;  %v584_v27 = vmul.f32 %v577_v56, %v2017_v14  ;;  %v2211_v56 = vpop.permute.xlu2 %104  ;;  %v1907_v57 = vmov 15  }
 0x3da   :  { %597 = vrot.lane.b32.xlu0 %v582_v23, %s1904_s22  ;;  %593 = vrot.lane.b32.xlu1 %v580_v59, %s1904_s22 }
 0x3db   :  { %591 = vrot.lane.b32.xlu2 %v579_v58, %s1904_s22 }
 0x3e1   :  { %v2213_v58 = vpop.permute.xlu2 %145 }
 0x3e2   :  { %617 = vperm.xlu0 %1745, %v1990_v3   ;;  %599 = vrot.lane.b32.xlu1 %v583_v24, %s1904_s22 }
 0x3e3   :  { %595 = vrot.lane.b32.xlu2 %v581_v25, %s1904_s22 }
 0x3e9   :  { %v2217_v23 = vpop.permute.xlu2 %151 }
 0x3ea   :  { %621 = vperm.xlu1 %1746, %v1996_v4   ;;  %1747 = vset.pattern.permute.xlu0 %v1905_v28 }
 0x3eb   :  { %601 = vrot.lane.b32.xlu2 %v584_v27, %s1904_s22 }
 0x3f1   :  { %v2223_v27 = vpop.permute.xlu2 %186 }
 0x3f2   :  { %1748 = vset.pattern.permute.xlu1 %v1905_v28 }
 0x44c   :  { %v2193_v31 = vpop.permute.xlu1 %593  ;;  %v2195_v32 = vpop.permute.xlu0 %597 }
 0x44d   :  { %2942 = vst [vmem:[#allocation22_spill] sm:$0xff] %v2193_v31 }
 0x44e   :  { %2943 = vst [vmem:[#allocation23_spill] sm:$0xff] %v2195_v32  ;;  %v1909_v32 = vmov 16  }
 0x454   :  { %v2197_v33 = vpop.permute.xlu1 %599  ;;  %v618_v34 = vpop.permute.xlu0 %617 }
 0x455   :  { %2944 = vst [vmem:[#allocation24_spill] sm:$0xff] %v2197_v33  ;;  %v624_v41 = vmul.f32 %v618_v34, %v2011_v9  ;;  %v625_v42 = vmul.f32 %v618_v34, %v2019_v15  ;;  %v626_v46 = vmul.f32 %v618_v34, %v2009_v8 }
 0x457   :  { %638 = vrot.lane.b32.xlu1 %v625_v42, %s1906_s23  ;;  %636 = vrot.lane.b32.xlu2 %v624_v41, %s1906_s23 }
 0x45c   :  { %v622_v43 = vpop.permute.xlu1 %621 }
 0x45d   :  { %v627_v44 = vmul.f32 %v622_v43, %v2015_v13  ;;  %v628_v45 = vmul.f32 %v622_v43, %v2024_v20  ;;  %v629_v47 = vmul.f32 %v622_v43, %v2017_v14 }
 0x45f   :  { %642 = vrot.lane.b32.xlu0 %v627_v44, %s1906_s23  ;;  %644 = vrot.lane.b32.xlu1 %v628_v45, %s1906_s23  ;;  %v2228_v44 = vpop.permute.xlu2 %190 }
 0x460   :  { %640 = vrot.lane.b32.xlu2 %v626_v46, %s1906_s23 }
 0x467   :  { %662 = vperm.xlu0 %1747, %v1990_v3   ;;  %666 = vperm.xlu1 %1748, %v1996_v4  }
 0x468   :  { %646 = vrot.lane.b32.xlu2 %v629_v47, %s1906_s23  ;;  %v2233_v47 = vpop.permute.xlu2 %196 }
 0x46f   :  { %1749 = vset.pattern.permute.xlu0 %v1907_v57  ;;  %1750 = vset.pattern.permute.xlu1 %v1907_v57 }
 0x4c9   :  { %v2215_v59 = vpop.permute.xlu1 %638 }
 0x4ca   :  { %2945 = vst [vmem:[#allocation25_spill] sm:$0xff] %v2215_v59 }
 0x4d1   :  { %v2219_v24 = vpop.permute.xlu1 %644  ;;  %v2221_v25 = vpop.permute.xlu0 %642 }
 0x4d2   :  { %2946 = vst [vmem:[#allocation26_spill] sm:$0xff] %v2219_v24 }
 0x4d3   :  { %2947 = vst [vmem:[#allocation27_spill] sm:$0xff] %v2221_v25 }
 0x4d9   :  { %v667_v28 = vpop.permute.xlu1 %666  ;;  %v663_v34 = vpop.permute.xlu0 %662 }
 0x4da   :  { %v669_v41 = vmul.f32 %v663_v34, %v2011_v9  ;;  %v670_v42 = vmul.f32 %v663_v34, %v2019_v15  ;;  %v672_v43 = vmul.f32 %v667_v28, %v2015_v13  ;;  %v673_v45 = vmul.f32 %v667_v28, %v2024_v20 }
 0x4db   :  { %v671_v46 = vmul.f32 %v663_v34, %v2009_v8  ;;  %v674_v57 = vmul.f32 %v667_v28, %v2017_v14 }
 0x4dc   :  { %687 = vrot.lane.b32.xlu0 %v672_v43, %s1908_s24  ;;  %683 = vrot.lane.b32.xlu1 %v670_v42, %s1908_s24  ;;  %v2237_v43 = vpop.permute.xlu2 %231 }
 0x4dd   :  { %681 = vrot.lane.b32.xlu2 %v669_v41, %s1908_s24 }
 0x4e4   :  { %707 = vperm.xlu0 %1749, %v1990_v3   ;;  %689 = vrot.lane.b32.xlu1 %v673_v45, %s1908_s24  ;;  %v2239_v41 = vpop.permute.xlu2 %235 }
 0x4e5   :  { %685 = vrot.lane.b32.xlu2 %v671_v46, %s1908_s24 }
 0x4ec   :  { %711 = vperm.xlu1 %1750, %v1996_v4   ;;  %v2241_v42 = vpop.permute.xlu2 %241  ;;  %1751 = vset.pattern.permute.xlu0 %v1909_v32 }
 0x4ed   :  { %691 = vrot.lane.b32.xlu2 %v674_v57, %s1908_s24 }
 0x4f4   :  { %v2243_v25 = vpop.permute.xlu2 %276  ;;  %1752 = vset.pattern.permute.xlu1 %v1909_v32 }
 0x4fc   :  { %v2245_v34 = vpop.permute.xlu2 %280 }
 0x504   :  { %v2247_v24 = vpop.permute.xlu2 %286 }
 0x50c   :  { %v2249_v45 = vpop.permute.xlu2 %321 }
 0x514   :  { %v2251_v46 = vpop.permute.xlu2 %325 }
 0x51c   :  { %v2253_v28 = vpop.permute.xlu2 %331 }
 0x524   :  { %v2255_v57 = vpop.permute.xlu2 %366 }
 0x52c   :  { %v2261_v54 = vpop.permute.xlu2 %370 }
 0x534   :  { %v2267_v32 = vpop.permute.xlu2 %376 }
 0x54e   :  { %v2257_v33 = vpop.permute.xlu1 %683  ;;  %v2259_v55 = vpop.permute.xlu0 %687 }
 0x54f   :  { %2948 = vst [vmem:[#allocation28_spill] sm:$0xff] %v2257_v33 }
 0x550   :  { %2949 = vst [vmem:[#allocation29_spill] sm:$0xff] %v2259_v55 }
 0x556   :  { %v2263_v59 = vpop.permute.xlu1 %689  ;;  %v708_v31 = vpop.permute.xlu0 %707 }
 0x557   :  { %2950 = vst [vmem:[#allocation30_spill] sm:$0xff] %v2263_v59  ;;  %v714_v53 = vmul.f32 %v708_v31, %v2011_v9  ;;  %v715_v39 = vmul.f32 %v708_v31, %v2019_v15  ;;  %v716_v55 = vmul.f32 %v708_v31, %v2009_v8  ;;  %v2272_v59 = vpop.permute.xlu2 %411 }
 0x558   :  { %2951 = vst [vmem:[#allocation31_spill] sm:$0xff] %v2272_v59 }
 0x559   :  { %728 = vrot.lane.b32.xlu1 %v715_v39, %s1910_s25  ;;  %726 = vrot.lane.b32.xlu2 %v714_v53, %s1910_s25 }
 0x55e   :  { %v712_v40 = vpop.permute.xlu1 %711 }
 0x55f   :  { %v717_v35 = vmul.f32 %v712_v40, %v2015_v13  ;;  %v718_v33 = vmul.f32 %v712_v40, %v2024_v20  ;;  %v719_v1 = vmul.f32 %v712_v40, %v2017_v14  ;;  %v2277_v39 = vpop.permute.xlu2 %415 }
 0x560   :  { %2952 = vst [vmem:[#allocation32_spill] sm:$0xff] %v2277_v39 }
 0x561   :  { %732 = vrot.lane.b32.xlu0 %v717_v35, %s1910_s25  ;;  %734 = vrot.lane.b32.xlu1 %v718_v33, %s1910_s25 }
 0x562   :  { %730 = vrot.lane.b32.xlu2 %v716_v55, %s1910_s25 }
 0x567   :  { %v2279_v53 = vpop.permute.xlu2 %421 }
 0x568   :  { %2953 = vst [vmem:[#allocation33_spill] sm:$0xff] %v2279_v53 }
 0x569   :  { %752 = vperm.xlu0 %1751, %v1990_v3   ;;  %756 = vperm.xlu1 %1752, %v1996_v4  }
 0x56a   :  { %736 = vrot.lane.b32.xlu2 %v719_v1, %s1910_s25 }
 0x56f   :  { %v2281_v62 = vpop.permute.xlu2 %456 }
 0x570   :  { %2954 = vst [vmem:[#allocation34_spill] sm:$0xff] %v2281_v62 }
 0x571   :  { %1753 = vset.pattern.permute.xlu0 %v1911_v49  ;;  %1754 = vset.pattern.permute.xlu1 %v1911_v49 }
 0x577   :  { %v2283_v60 = vpop.permute.xlu2 %460 }
 0x578   :  { %2955 = vst [vmem:[#allocation35_spill] sm:$0xff] %v2283_v60 }
 0x57f   :  { %v2285_v35 = vpop.permute.xlu2 %466 }
 0x580   :  { %2956 = vst [vmem:[#allocation36_spill] sm:$0xff] %v2285_v35 }
 0x587   :  { %v2287_v55 = vpop.permute.xlu2 %501 }
 0x588   :  { %2957 = vst [vmem:[#allocation37_spill] sm:$0xff] %v2287_v55 }
 0x58f   :  { %v2289_v31 = vpop.permute.xlu2 %505 }
 0x590   :  { %2958 = vst [vmem:[#allocation38_spill] sm:$0xff] %v2289_v31 }
 0x597   :  { %v2291_v40 = vpop.permute.xlu2 %511 }
 0x598   :  { %2959 = vst [vmem:[#allocation39_spill] sm:$0xff] %v2291_v40 }
 0x59f   :  { %v2293_v33 = vpop.permute.xlu2 %546 }
 0x5a0   :  { %2960 = vst [vmem:[#allocation40_spill] sm:$0xff] %v2293_v33 }
 0x5a7   :  { %v2295_v1 = vpop.permute.xlu2 %550 }
 0x5a8   :  { %2961 = vst [vmem:[#allocation41_spill] sm:$0xff] %v2295_v1 }
 0x5af   :  { %v2299_v62 = vpop.permute.xlu2 %556 }
 0x5b0   :  { %2963 = vst [vmem:[#allocation43_spill] sm:$0xff] %v2299_v62 }
 0x5b7   :  { %v2305_v55 = vpop.permute.xlu2 %591 }
 0x5b8   :  { %2966 = vst [vmem:[#allocation46_spill] sm:$0xff] %v2305_v55 }
 0x5cb   :  { %v2297_v53 = vpop.permute.xlu1 %728 }
 0x5cc   :  { %2962 = vst [vmem:[#allocation42_spill] sm:$0xff] %v2297_v53  ;;  %v2310_v53 = vpop.permute.xlu2 %595 }
 0x5cd   :  { %2967 = vst [vmem:[#allocation47_spill] sm:$0xff] %v2310_v53 }
 0x5d3   :  { %v2301_v60 = vpop.permute.xlu1 %734  ;;  %v2303_v35 = vpop.permute.xlu0 %732 }
 0x5d4   :  { %2964 = vst [vmem:[#allocation44_spill] sm:$0xff] %v2301_v60  ;;  %v2315_v62 = vpop.permute.xlu2 %601 }
 0x5d5   :  { %2965 = vst [vmem:[#allocation45_spill] sm:$0xff] %v2303_v35 }
 0x5d6   :  { %2968 = vst [vmem:[#allocation48_spill] sm:$0xff] %v2315_v62 }
 0x5db   :  { %v757_v31 = vpop.permute.xlu1 %756  ;;  %v753_v50 = vpop.permute.xlu0 %752 }
 0x5dc   :  { %v762_v40 = vmul.f32 %v757_v31, %v2015_v13  ;;  %v759_v33 = vmul.f32 %v753_v50, %v2011_v9  ;;  %v760_v49 = vmul.f32 %v753_v50, %v2019_v15  ;;  %v761_v60 = vmul.f32 %v753_v50, %v2009_v8 }
 0x5dd   :  { %v763_v35 = vmul.f32 %v757_v31, %v2024_v20  ;;  %v764_v55 = vmul.f32 %v757_v31, %v2017_v14 }
 0x5de   :  { %777 = vrot.lane.b32.xlu0 %v762_v40, %s1912_s26  ;;  %771 = vrot.lane.b32.xlu2 %v759_v33, %s1912_s26  ;;  %v2319_v40 = vpop.permute.xlu2 %636 }
 0x5df   :  { %773 = vrot.lane.b32.xlu1 %v760_v49, %s1912_s26  ;;  %2969 = vst [vmem:[#allocation49_spill] sm:$0xff] %v2319_v40 }
 0x5e6   :  { %797 = vperm.xlu0 %1753, %v1990_v3   ;;  %775 = vrot.lane.b32.xlu2 %v761_v60, %s1912_s26  ;;  %v2321_v33 = vpop.permute.xlu2 %640 }
 0x5e7   :  { %779 = vrot.lane.b32.xlu1 %v763_v35, %s1912_s26  ;;  %2970 = vst [vmem:[#allocation50_spill] sm:$0xff] %v2321_v33 }
 0x5ee   :  { %781 = vrot.lane.b32.xlu2 %v764_v55, %s1912_s26  ;;  %v2323_v49 = vpop.permute.xlu2 %646  ;;  %v1913_v55 = vmov 18  }
 0x5ef   :  { %801 = vperm.xlu1 %1754, %v1996_v4   ;;  %2971 = vst [vmem:[#allocation51_spill] sm:$0xff] %v2323_v49  ;;  %1755 = vset.pattern.permute.xlu0 %v1913_v55 }
 0x5f6   :  { %v2325_v50 = vpop.permute.xlu2 %681 }
 0x5f7   :  { %2972 = vst [vmem:[#allocation52_spill] sm:$0xff] %v2325_v50  ;;  %1756 = vset.pattern.permute.xlu1 %v1913_v55 }
 0x5fe   :  { %v2327_v53 = vpop.permute.xlu2 %685 }
 0x5ff   :  { %2973 = vst [vmem:[#allocation53_spill] sm:$0xff] %v2327_v53 }
 0x606   :  { %v2329_v1 = vpop.permute.xlu2 %691 }
 0x607   :  { %2974 = vst [vmem:[#allocation54_spill] sm:$0xff] %v2329_v1 }
 0x60e   :  { %v2331_v60 = vpop.permute.xlu2 %726 }
 0x60f   :  { %2975 = vst [vmem:[#allocation55_spill] sm:$0xff] %v2331_v60 }
 0x616   :  { %v2333_v35 = vpop.permute.xlu2 %730 }
 0x617   :  { %2976 = vst [vmem:[#allocation56_spill] sm:$0xff] %v2333_v35 }
 0x61e   :  { %v2335_v31 = vpop.permute.xlu2 %736 }
 0x61f   :  { %2977 = vst [vmem:[#allocation57_spill] sm:$0xff] %v2335_v31 }
 0x638   :  { %v772_v62 = vpop.permute.xlu2 %771 }
 0x640   :  { %v776_v40 = vpop.permute.xlu2 %775 }
 0x650   :  { %v778_v33 = vpop.permute.xlu0 %777 }
 0x651   :  { %v774_v49 = vpop.permute.xlu1 %773 }
 0x652   :  { %v2338_v50 = vsel %vm783_vm0, %v772_v62, %v774_v49  ;;  %v2341_v53 = vsel %vm783_vm0, %v774_v49, %v776_v40 }
 0x653   :  { %2978 = vst [vmem:[#allocation58_spill] sm:$0xff] %v2338_v50 }
 0x654   :  { %2979 = vst [vmem:[#allocation59_spill] sm:$0xff] %v2341_v53 }
 0x658   :  { %v798_v1 = vpop.permute.xlu0 %797 }
 0x659   :  { %v2343_v60 = vpop.permute.xlu1 %779  ;;  %v804_v35 = vmul.f32 %v798_v1, %v2011_v9  ;;  %v805_v31 = vmul.f32 %v798_v1, %v2019_v15  ;;  %v806_v62 = vmul.f32 %v798_v1, %v2009_v8 }
 0x65a   :  { %2980 = vst [vmem:[#allocation60_spill] sm:$0xff] %v2343_v60  ;;  %v2349_v55 = vsel %vm783_vm0, %v778_v33, %v2343_v60  ;;  %v2357_v33 = vpop.permute.xlu2 %781 }
 0x65b   :  { %2981 = vst [vmem:[#allocation61_spill] sm:$0xff] %v2349_v55  ;;  %818 = vrot.lane.b32.xlu1 %v805_v31, %s1914_s27  ;;  %816 = vrot.lane.b32.xlu2 %v804_v35, %s1914_s27  ;;  %v1915_v31 = vmov 19  }
 0x65c   :  { %2982 = vst [vmem:[#allocation62_spill] sm:$0xff] %v2357_v33 }
 0x661   :  { %v802_v50 = vpop.permute.xlu1 %801 }
 0x662   :  { %v807_v40 = vmul.f32 %v802_v50, %v2015_v13  ;;  %v808_v49 = vmul.f32 %v802_v50, %v2024_v20  ;;  %v809_v53 = vmul.f32 %v802_v50, %v2017_v14 }
 0x663   :  { %820 = vrot.lane.b32.xlu2 %v806_v62, %s1914_s27 }
 0x664   :  { %822 = vrot.lane.b32.xlu0 %v807_v40, %s1914_s27  ;;  %824 = vrot.lane.b32.xlu1 %v808_v49, %s1914_s27 }
 0x66b   :  { %826 = vrot.lane.b32.xlu2 %v809_v53, %s1914_s27 }
 0x66c   :  { %842 = vperm.xlu0 %1755, %v1990_v3   ;;  %846 = vperm.xlu1 %1756, %v1996_v4  }
 0x674   :  { %1757 = vset.pattern.permute.xlu0 %v1915_v31  ;;  %1758 = vset.pattern.permute.xlu1 %v1915_v31 }
 0x6b5   :  { %v817_v35 = vpop.permute.xlu2 %816 }
 0x6bd   :  { %v821_v1 = vpop.permute.xlu2 %820 }
 0x6cd   :  { %v819_v55 = vpop.permute.xlu1 %818 }
 0x6ce   :  { %v2360_v62 = vsel %vm828_vm1, %v817_v35, %v819_v55  ;;  %v2363_v40 = vsel %vm828_vm1, %v819_v55, %v821_v1 }
 0x6cf   :  { %2983 = vst [vmem:[#allocation63_spill] sm:$0xff] %v2360_v62 }
 0x6d0   :  { %2984 = vst [vmem:[#allocation64_spill] sm:$0xff] %v2363_v40 }
 0x6d6   :  { %v2365_v53 = vpop.permute.xlu1 %824  ;;  %v823_v50 = vpop.permute.xlu0 %822 }
 0x6d7   :  { %2985 = vst [vmem:[#allocation65_spill] sm:$0xff] %v2365_v53  ;;  %v2369_v49 = vsel %vm828_vm1, %v823_v50, %v2365_v53  ;;  %v2379_v50 = vpop.permute.xlu2 %826 }
 0x6d8   :  { %2986 = vst [vmem:[#allocation66_spill] sm:$0xff] %v2369_v49  ;;  %v1917_v49 = vmov 20  }
 0x6d9   :  { %2987 = vst [vmem:[#allocation67_spill] sm:$0xff] %v2379_v50 }
 0x6de   :  { %v847_v60 = vpop.permute.xlu1 %846  ;;  %v843_v33 = vpop.permute.xlu0 %842 }
 0x6df   :  { %v852_v31 = vmul.f32 %v847_v60, %v2015_v13  ;;  %v849_v39 = vmul.f32 %v843_v33, %v2011_v9  ;;  %v850_v59 = vmul.f32 %v843_v33, %v2019_v15  ;;  %v851_v55 = vmul.f32 %v843_v33, %v2009_v8 }
 0x6e0   :  { %v853_v35 = vmul.f32 %v847_v60, %v2024_v20  ;;  %v854_v1 = vmul.f32 %v847_v60, %v2017_v14 }
 0x6e1   :  { %867 = vrot.lane.b32.xlu0 %v852_v31, %s1916_s28  ;;  %861 = vrot.lane.b32.xlu2 %v849_v39, %s1916_s28 }
 0x6e2   :  { %863 = vrot.lane.b32.xlu1 %v850_v59, %s1916_s28 }
 0x6e9   :  { %887 = vperm.xlu0 %1757, %v1990_v3   ;;  %865 = vrot.lane.b32.xlu2 %v851_v55, %s1916_s28 }
 0x6ea   :  { %869 = vrot.lane.b32.xlu1 %v853_v35, %s1916_s28 }
 0x6f1   :  { %871 = vrot.lane.b32.xlu2 %v854_v1, %s1916_s28  ;;  %1759 = vset.pattern.permute.xlu0 %v1917_v49 }
 0x6f2   :  { %891 = vperm.xlu1 %1758, %v1996_v4  }
 0x6fa   :  { %1760 = vset.pattern.permute.xlu1 %v1917_v49 }
 0x73b   :  { %v862_v39 = vpop.permute.xlu2 %861 }
 0x743   :  { %v866_v33 = vpop.permute.xlu2 %865 }
 0x753   :  { %v868_v59 = vpop.permute.xlu0 %867 }
 0x754   :  { %v864_v31 = vpop.permute.xlu1 %863 }
 0x755   :  { %v2382_v53 = vsel %vm873_vm2, %v862_v39, %v864_v31  ;;  %v2385_v55 = vsel %vm873_vm2, %v864_v31, %v866_v33 }
 0x756   :  { %2988 = vst [vmem:[#allocation68_spill] sm:$0xff] %v2382_v53 }
 0x757   :  { %2989 = vst [vmem:[#allocation69_spill] sm:$0xff] %v2385_v55 }
 0x75b   :  { %v888_v60 = vpop.permute.xlu0 %887 }
 0x75c   :  { %v2387_v35 = vpop.permute.xlu1 %869  ;;  %v894_v1 = vmul.f32 %v888_v60, %v2011_v9  ;;  %v895_v50 = vmul.f32 %v888_v60, %v2019_v15  ;;  %v896_v39 = vmul.f32 %v888_v60, %v2009_v8 }
 0x75d   :  { %2990 = vst [vmem:[#allocation70_spill] sm:$0xff] %v2387_v35  ;;  %v2393_v49 = vsel %vm873_vm2, %v868_v59, %v2387_v35  ;;  %v2401_v59 = vpop.permute.xlu2 %871 }
 0x75e   :  { %2991 = vst [vmem:[#allocation71_spill] sm:$0xff] %v2393_v49  ;;  %908 = vrot.lane.b32.xlu1 %v895_v50, %s1918_s29  ;;  %906 = vrot.lane.b32.xlu2 %v894_v1, %s1918_s29  ;;  %v1919_v1 = vmov 21  }
 0x75f   :  { %2992 = vst [vmem:[#allocation72_spill] sm:$0xff] %v2401_v59 }
 0x764   :  { %v892_v53 = vpop.permute.xlu1 %891 }
 0x765   :  { %v897_v33 = vmul.f32 %v892_v53, %v2015_v13  ;;  %v898_v31 = vmul.f32 %v892_v53, %v2024_v20  ;;  %v899_v55 = vmul.f32 %v892_v53, %v2017_v14 }
 0x766   :  { %910 = vrot.lane.b32.xlu2 %v896_v39, %s1918_s29 }
 0x767   :  { %912 = vrot.lane.b32.xlu0 %v897_v33, %s1918_s29  ;;  %914 = vrot.lane.b32.xlu1 %v898_v31, %s1918_s29 }
 0x76e   :  { %916 = vrot.lane.b32.xlu2 %v899_v55, %s1918_s29 }
 0x76f   :  { %932 = vperm.xlu0 %1759, %v1990_v3   ;;  %936 = vperm.xlu1 %1760, %v1996_v4  }
 0x777   :  { %1761 = vset.pattern.permute.xlu0 %v1919_v1  ;;  %1762 = vset.pattern.permute.xlu1 %v1919_v1 }
 0x7b8   :  { %v907_v50 = vpop.permute.xlu2 %906 }
 0x7c0   :  { %v911_v60 = vpop.permute.xlu2 %910 }
 0x7d0   :  { %v909_v49 = vpop.permute.xlu1 %908 }
 0x7d1   :  { %v2404_v39 = vsel %vm918_vm3, %v907_v50, %v909_v49  ;;  %v2407_v33 = vsel %vm918_vm3, %v909_v49, %v911_v60  ;;  %v2423_v60 = vld [vmem:[%s2905_s2] sm:$0xff] }
 0x7d2   :  { %2993 = vst [vmem:[#allocation73_spill] sm:$0xff] %v2404_v39 }
 0x7d3   :  { %2994 = vst [vmem:[#allocation74_spill] sm:$0xff] %v2407_v33 }
 0x7d9   :  { %v2409_v53 = vpop.permute.xlu1 %914  ;;  %v913_v3 = vpop.permute.xlu0 %912 }
 0x7da   :  { %2995 = vst [vmem:[#allocation75_spill] sm:$0xff] %v2409_v53  ;;  %v2413_v4 = vsel %vm918_vm3, %v913_v3, %v2409_v53 }
 0x7db   :  { %2996 = vst [vmem:[#allocation76_spill] sm:$0xff] %v2413_v4 }
 0x7e1   :  { %v937_v55 = vpop.permute.xlu1 %936  ;;  %v933_v31 = vpop.permute.xlu0 %932 }
 0x7e2   :  { %v942_v1 = vmul.f32 %v937_v55, %v2015_v13  ;;  %v939_v35 = vmul.f32 %v933_v31, %v2011_v9  ;;  %v940_v59 = vmul.f32 %v933_v31, %v2019_v15  ;;  %v941_v49 = vmul.f32 %v933_v31, %v2009_v8  ;;  %v2430_v13 = vld [vmem:[%s2905_s2 + $0x8] sm:$0xff]  ;;  %v2433_v8 = vpop.permute.xlu2 %916  ;;  %s1922_s2 = smov 107  }
 0x7e3   :  { %v943_v50 = vmul.f32 %v937_v55, %v2024_v20  ;;  %v944_v9 = vmul.f32 %v937_v55, %v2017_v14  ;;  %2997 = vst [vmem:[#allocation77_spill] sm:$0xff] %v2433_v8  ;;  %v1921_v15 = vmov 22   ;;  %v2456_v8 = vld [vmem:[#allocation2 + $0x18] sm:$0xff] }
 0x7e4   :  { %957 = vrot.lane.b32.xlu0 %v942_v1, %s1920_s30  ;;  %951 = vrot.lane.b32.xlu2 %v939_v35, %s1920_s30 }
 0x7e5   :  { %953 = vrot.lane.b32.xlu1 %v940_v59, %s1920_s30 }
 0x7ec   :  { %977 = vperm.xlu0 %1761, %v2423_v60   ;;  %955 = vrot.lane.b32.xlu2 %v941_v49, %s1920_s30  ;;  %v2443_v49 = vld [vmem:[#allocation2] sm:$0xff] }
 0x7ed   :  { %959 = vrot.lane.b32.xlu1 %v943_v50, %s1920_s30 }
 0x7f4   :  { %961 = vrot.lane.b32.xlu2 %v944_v9, %s1920_s30  ;;  %1763 = vset.pattern.permute.xlu0 %v1921_v15  ;;  %v2446_v9 = vld [vmem:[#allocation2 + $0x8] sm:$0xff] }
 0x7f5   :  { %981 = vperm.xlu1 %1762, %v2430_v13  }
 0x7fd   :  { %1764 = vset.pattern.permute.xlu1 %v1921_v15 }
 0x83e   :  { %v952_v20 = vpop.permute.xlu2 %951 }
 0x846   :  { %v956_v59 = vpop.permute.xlu2 %955 }
 0x856   :  { %v958_v35 = vpop.permute.xlu0 %957 }
 0x857   :  { %v954_v3 = vpop.permute.xlu1 %953 }
 0x858   :  { %v2436_v14 = vsel %vm963_vm4, %v952_v20, %v954_v3  ;;  %v2439_v55 = vsel %vm963_vm4, %v954_v3, %v956_v59  ;;  %v1923_v20 = vmov 23   ;;  %v2453_v59 = vld [vmem:[#allocation2 + $0x10] sm:$0xff] }
 0x859   :  { %2998 = vst [vmem:[#allocation78_spill] sm:$0xff] %v2436_v14  ;;  %1765 = vset.pattern.permute.xlu2 %v1923_v20 }
 0x85a   :  { %2999 = vst [vmem:[#allocation79_spill] sm:$0xff] %v2439_v55  ;;  %v2459_v55 = vld [vmem:[#allocation2 + $0x20] sm:$0xff] }
 0x85e   :  { %v978_v31 = vpop.permute.xlu0 %977 }
 0x85f   :  { %v2441_v1 = vpop.permute.xlu1 %959  ;;  %v984_v50 = vmul.f32 %v2443_v49, %v978_v31  ;;  %v985_v15 = vmul.f32 %v2446_v9, %v978_v31  ;;  %v986_v3 = vmul.f32 %v2453_v59, %v978_v31  ;;  %v1924_v31 = vmov 24  }
 0x860   :  { %3000 = vst [vmem:[#allocation80_spill] sm:$0xff] %v2441_v1  ;;  %v2451_v4 = vsel %vm963_vm4, %v958_v35, %v2441_v1  ;;  %v2462_v35 = vld [vmem:[#allocation2 + $0x28] sm:$0xff] }
 0x861   :  { %3001 = vst [vmem:[#allocation81_spill] sm:$0xff] %v2451_v4  ;;  %998 = vrot.lane.b32.xlu1 %v985_v15, %s1922_s2  ;;  %996 = vrot.lane.b32.xlu2 %v984_v50, %s1922_s2  ;;  %v1928_v15 = vmov 26  }
 0x867   :  { %v982_v53 = vpop.permute.xlu1 %981 }
 0x868   :  { %v987_v14 = vmul.f32 %v2456_v8, %v982_v53  ;;  %v988_v39 = vmul.f32 %v2459_v55, %v982_v53  ;;  %v989_v50 = vmul.f32 %v2462_v35, %v982_v53  ;;  %v1926_v53 = vmov 25  }
 0x869   :  { %1000 = vrot.lane.b32.xlu2 %v986_v3, %s1922_s2  ;;  %v1930_v3 = vmov 28  }
 0x86a   :  { %1002 = vrot.lane.b32.xlu0 %v987_v14, %s1922_s2  ;;  %1004 = vrot.lane.b32.xlu1 %v988_v39, %s1922_s2  ;;  %v1925_v39 = vmov 27   ;;  %v1927_v14 = vmov 29  }
 0x871   :  { %1006 = vrot.lane.b32.xlu2 %v989_v50, %s1922_s2  ;;  %v1931_v50 = vmov 30  }
 0x872   :  { %1022 = vperm.xlu0 %1763, %v2423_v60   ;;  %1026 = vperm.xlu1 %1764, %v2430_v13  }
 0x879   :  { %1071 = vperm.xlu2 %1765, %v2430_v13  }
 0x87a   :  { %1768 = vset.pattern.permute.xlu0 %v1924_v31  ;;  %1766 = vset.pattern.permute.xlu1 %v1923_v20  ;;  %v1929_v20 = vmov 0  }
 0x87b   :  { %1112 = vperm.xlu0 %1768, %v2423_v60   ;;  %1067 = vperm.xlu1 %1766, %v2423_v60  }
 0x881   :  { %1767 = vset.pattern.permute.xlu2 %v1924_v31  ;;  %v1932_v31 = vmov 31  }
 0x882   :  { %1116 = vperm.xlu2 %1767, %v2430_v13  }
 0x883   :  { %1773 = vset.pattern.permute.xlu0 %v1925_v39  ;;  %1769 = vset.pattern.permute.xlu1 %v1926_v53 }
 0x884   :  { %1251 = vperm.xlu0 %1773, %v2430_v13   ;;  %1161 = vperm.xlu1 %1769, %v2430_v13  }
 0x88a   :  { %1770 = vset.pattern.permute.xlu2 %v1926_v53 }
 0x88b   :  { %1157 = vperm.xlu2 %1770, %v2423_v60  }
 0x88c   :  { %1778 = vset.pattern.permute.xlu0 %v1927_v14  ;;  %1771 = vset.pattern.permute.xlu1 %v1928_v15 }
 0x88d   :  { %1337 = vperm.xlu0 %1778, %v2423_v60   ;;  %1206 = vperm.xlu1 %1771, %v2430_v13  }
 0x893   :  { %1772 = vset.pattern.permute.xlu2 %v1928_v15 }
 0x894   :  { %1202 = vperm.xlu2 %1772, %v2423_v60  }
 0x895   :  { %1779 = vset.pattern.permute.xlu0 %v1929_v20  ;;  %1774 = vset.pattern.permute.xlu1 %v1925_v39  ;;  %v2485_v39 = vpop.permute.xlu2 %961 }
 0x896   :  { %64 = vperm.xlu0 %1779, %v2423_v60   ;;  %1247 = vperm.xlu1 %1774, %v2423_v60   ;;  %3002 = vst [vmem:[#allocation82_spill] sm:$0xff] %v2485_v39 }
 0x89c   :  { %1775 = vset.pattern.permute.xlu2 %v1930_v3 }
 0x89d   :  { %1296 = vperm.xlu2 %1775, %v2430_v13  }
 0x89e   :  { %69 = vperm.xlu0 %1779, %v2430_v13   ;;  %1776 = vset.pattern.permute.xlu1 %v1930_v3 }
 0x89f   :  { %1292 = vperm.xlu1 %1776, %v2423_v60  }
 0x8a5   :  { %1777 = vset.pattern.permute.xlu2 %v1927_v14 }
 0x8a6   :  { %1341 = vperm.xlu2 %1777, %v2430_v13  }
 0x8a7   :  { %1780 = vset.pattern.permute.xlu1 %v1931_v50 }
 0x8a8   :  { %1386 = vperm.xlu1 %1780, %v2430_v13  }
 0x8ae   :  { %1781 = vset.pattern.permute.xlu2 %v1931_v50 }
 0x8af   :  { %1382 = vperm.xlu2 %1781, %v2423_v60  }
 0x8b0   :  { %1782 = vset.pattern.permute.xlu1 %v1932_v31 }
 0x8b1   :  { %1431 = vperm.xlu1 %1782, %v2430_v13  }
 0x8b7   :  { %1783 = vset.pattern.permute.xlu2 %v1932_v31 }
 0x8b8   :  { %1427 = vperm.xlu2 %1783, %v2423_v60  }
 0x8b9   :  { %1784 = vset.pattern.permute.xlu1 %v1929_v20 }
 0x8bb   :  { %v997_v53 = vpop.permute.xlu2 %996 }
 0x8c0   :  { %1785 = vset.pattern.permute.xlu2 %v1929_v20 }
 0x8c3   :  { %v1001_v14 = vpop.permute.xlu2 %1000 }
 0x8cb   :  { %v1007_v4 = vpop.permute.xlu2 %1006 }
 0x8d3   :  { %v999_v15 = vpop.permute.xlu1 %998 }
 0x8d4   :  { %v2489_v3 = vsel %vm1008_vm5, %v997_v53, %v999_v15  ;;  %v2491_v50 = vsel %vm1008_vm5, %v999_v15, %v1001_v14 }
 0x8dc   :  { %v1005_v1 = vpop.permute.xlu1 %1004  ;;  %v1003_v33 = vpop.permute.xlu0 %1002 }
 0x8dd   :  { %v2493_v31 = vsel %vm1008_vm5, %v1005_v1, %v1007_v4  ;;  %v2495_v39 = vsel %vm1008_vm5, %v1003_v33, %v1005_v1  ;;  %v1072_v1 = vpop.permute.xlu2 %1071  ;;  %vm558_vm5 = vcmask 957440  }
 0x8de   :  { %3003 = vst [vmem:[#allocation83_spill] sm:$0xff] %v2495_v39  ;;  %v1077_v15 = vmul.f32 %v2456_v8, %v1072_v1  ;;  %v1078_v39 = vmul.f32 %v2459_v55, %v1072_v1 }
 0x8e4   :  { %v1027_v13 = vpop.permute.xlu1 %1026  ;;  %v1023_v62 = vpop.permute.xlu0 %1022 }
 0x8e5   :  { %v1032_v60 = vmul.f32 %v2456_v8, %v1027_v13  ;;  %v1033_v20 = vmul.f32 %v2459_v55, %v1027_v13  ;;  %v1034_v40 = vmul.f32 %v2462_v35, %v1027_v13  ;;  %v1029_v53 = vmul.f32 %v2443_v49, %v1023_v62 }
 0x8e6   :  { %v1030_v14 = vmul.f32 %v2446_v9, %v1023_v62  ;;  %v1031_v4 = vmul.f32 %v2453_v59, %v1023_v62  ;;  %v1079_v13 = vmul.f32 %v2462_v35, %v1072_v1 }
 0x8e7   :  { %1049 = vrot.lane.b32.xlu1 %v1033_v20, %s1933_s9  ;;  %1047 = vrot.lane.b32.xlu0 %v1032_v60, %s1933_s9 }
 0x8e8   :  { %1051 = vrot.lane.b32.xlu2 %v1034_v40, %s1933_s9 }
 0x8ed   :  { %v1113_v33 = vpop.permute.xlu0 %1112  ;;  %v1068_v40 = vpop.permute.xlu1 %1067 }
 0x8ee   :  { %v1074_v62 = vmul.f32 %v2443_v49, %v1068_v40  ;;  %v1075_v60 = vmul.f32 %v2446_v9, %v1068_v40 }
 0x8ef   :  { %1043 = vrot.lane.b32.xlu1 %v1030_v14, %s1933_s9  ;;  %1041 = vrot.lane.b32.xlu0 %v1029_v53, %s1933_s9  ;;  %v1076_v53 = vmul.f32 %v2453_v59, %v1068_v40  ;;  %v1117_v14 = vpop.permute.xlu2 %1116  ;;  %v110_v40 = vsel %vm108_vm6, %v2209_v52, %v2073_v61  ;;  %v154_v61 = vsel %vm153_vm7, %v2085_v5, %v2083_v2 }
 0x8f0   :  { %1045 = vrot.lane.b32.xlu2 %v1031_v4, %s1933_s9  ;;  %v1122_v1 = vmul.f32 %v2456_v8, %v1117_v14 }
 0x8f6   :  { %v2506_v20 = vpop.permute.xlu0 %1251 }
 0x8f7   :  { %1094 = vrot.lane.b32.xlu1 %v1078_v39, %s1934_s10  ;;  %1092 = vrot.lane.b32.xlu0 %v1077_v15, %s1934_s10  ;;  %v1123_v39 = vmul.f32 %v2459_v55, %v1117_v14  ;;  %v1124_v15 = vmul.f32 %v2462_v35, %v1117_v14  ;;  %v245_v14 = vsel %vm243_vm9, %v2099_v17, %v2239_v41 }
 0x8f8   :  { %1096 = vrot.lane.b32.xlu2 %v1079_v13, %s1934_s10  ;;  %v109_v13 = vsel %vm108_vm6, %v2207_v51, %v2209_v52  ;;  %v157_v51 = vsel %vm153_vm7, %v2087_v6, %v2217_v23  ;;  %v199_v52 = vsel %vm198_vm8, %v2223_v27, %v2091_v10  ;;  %v1119_v23 = vmul.f32 %v2443_v49, %v1113_v33 }
 0x8f9   :  { %v334_v41 = vsel %vm333_vm11, %v2249_v45, %v2114_v29 }
 0x8ff   :  { %1088 = vrot.lane.b32.xlu1 %v1075_v60, %s1934_s10  ;;  %1086 = vrot.lane.b32.xlu0 %v1074_v62, %s1934_s10  ;;  %v2511_v4 = vpop.permute.xlu0 %1337  ;;  %v2520_v60 = vpop.permute.xlu2 %1157  ;;  %v111_v62 = vsel %vm108_vm6, %v2077_v63, %v2211_v56  ;;  %v156_v63 = vsel %vm153_vm7, %v2089_v7, %v2087_v6  ;;  %v201_v6 = vsel %vm198_vm8, %v2093_v11, %v2095_v12 }
 0x900   :  { %3004 = vst [vmem:[#allocation84_spill] sm:$0xff] %v2511_v4  ;;  %1090 = vrot.lane.b32.xlu2 %v1076_v53, %s1934_s10  ;;  %v112_v53 = vsel %vm108_vm6, %v2211_v56, %v2079_v0  ;;  %v155_v4 = vsel %vm153_vm7, %v2083_v2, %v2213_v58  ;;  %v200_v56 = vsel %vm198_vm8, %v2091_v10, %v2228_v44  ;;  %vm603_vm6 = vcmask 949248  }
 0x901   :  { %v202_v7 = vsel %vm198_vm8, %v2095_v12, %v2233_v47  ;;  %v244_v58 = vsel %vm243_vm9, %v2237_v43, %v2099_v17  ;;  %v1120_v10 = vmul.f32 %v2446_v9, %v1113_v33  ;;  %v246_v11 = vsel %vm243_vm9, %v2097_v16, %v2103_v19 }
 0x902   :  { %v247_v12 = vsel %vm243_vm9, %v2103_v19, %v2241_v42  ;;  %v1121_v47 = vmul.f32 %v2453_v59, %v1113_v33  ;;  %v289_v43 = vsel %vm288_vm10, %v2243_v25, %v2107_v22  ;;  %v290_v17 = vsel %vm288_vm10, %v2107_v22, %v2245_v34 }
 0x903   :  { %v291_v16 = vsel %vm288_vm10, %v2101_v18, %v2111_v26  ;;  %v292_v19 = vsel %vm288_vm10, %v2111_v26, %v2247_v24  ;;  %v2584_v25 = vsel %vm333_vm11, %v2105_v21, %v2116_v30  ;;  %v1162_v18 = vpop.permute.xlu1 %1161  ;;  %v335_v22 = vsel %vm333_vm11, %v2114_v29, %v2251_v46 }
 0x904   :  { %v337_v26 = vsel %vm333_vm11, %v2116_v30, %v2253_v28  ;;  %v379_v21 = vsel %vm378_vm12, %v2255_v57, %v2123_v36  ;;  %v380_v30 = vsel %vm378_vm12, %v2123_v36, %v2261_v54  ;;  %v382_v46 = vsel %vm378_vm12, %v2125_v37, %v2267_v32 }
 0x905   :  { %v381_v28 = vsel %vm378_vm12, %v2127_v38, %v2125_v37  ;;  %v1168_v57 = vmul.f32 %v2459_v55, %v1162_v18  ;;  %v1167_v36 = vmul.f32 %v2456_v8, %v1162_v18  ;;  %v1169_v54 = vmul.f32 %v2462_v35, %v1162_v18  ;;  %v3006_v37 = vld [vmem:[#allocation32_spill] sm:$0xff] }
 0x906   :  { %v425_v38 = vsel %vm423_vm13, %v2137_v48, %v3006_v37  ;;  %v3023_v37 = vld [vmem:[#allocation41_spill] sm:$0xff]  ;;  %vm648_vm7 = vcmask 941056   ;;  %vm693_vm8 = vcmask 932864   ;;  %vm738_vm9 = vcmask 924672  }
 0x907   :  { %1139 = vrot.lane.b32.xlu1 %v1123_v39, %s1935_s11  ;;  %1137 = vrot.lane.b32.xlu0 %v1122_v1, %s1935_s11  ;;  %v2598_v34 = vpop.permute.xlu2 %1202  ;;  %vm1278_vm10 = vcmask 826368   ;;  %vm1323_vm11 = vcmask 818176   ;;  %vm1368_vm12 = vcmask 809984  }
 0x908   :  { %1141 = vrot.lane.b32.xlu2 %v1124_v15, %s1935_s11  ;;  %v65_v0 = vpop.permute.xlu0 %64 }
 0x909   :  { %v72_v2 = vmul.f32 %v2443_v49, %v65_v0  ;;  %v73_v5 = vmul.f32 %v2446_v9, %v65_v0 }
 0x90b   :  { %v117_v27 = vadd.f32 %v109_v13, %v72_v2  ;;  %v118_v44 = vadd.f32 %v110_v40, %v73_v5 }
 0x90d   :  { %v162_v1 = vadd.f32 %v154_v61, %v117_v27  ;;  %v163_v39 = vadd.f32 %v155_v4, %v118_v44 }
 0x90f   :  { %v207_v42 = vadd.f32 %v199_v52, %v162_v1  ;;  %v208_v33 = vadd.f32 %v200_v56, %v163_v39  ;;  %1133 = vrot.lane.b32.xlu1 %v1120_v10, %s1935_s11  ;;  %1131 = vrot.lane.b32.xlu0 %v1119_v23, %s1935_s11  ;;  %v3005_v52 = vld [vmem:[#allocation31_spill] sm:$0xff]  ;;  %v3007_v23 = vld [vmem:[#allocation12_spill] sm:$0xff]  ;;  %v3009_v10 = vld [vmem:[#allocation33_spill] sm:$0xff] }
 0x910   :  { %1135 = vrot.lane.b32.xlu2 %v1121_v47, %s1935_s11  ;;  %v70_v24 = vpop.permute.xlu0 %69  ;;  %v424_v56 = vsel %vm423_vm13, %v3005_v52, %v2137_v48  ;;  %v427_v27 = vsel %vm423_vm13, %v3007_v23, %v3009_v10  ;;  %v3012_v1 = vld [vmem:[#allocation35_spill] sm:$0xff] }
 0x911   :  { %v252_v45 = vadd.f32 %v244_v58, %v207_v42  ;;  %v253_v4 = vadd.f32 %v245_v14, %v208_v33  ;;  %v74_v15 = vmul.f32 %v2456_v8, %v70_v24  ;;  %v75_v29 = vmul.f32 %v2459_v55, %v70_v24  ;;  %v3016_v24 = vld [vmem:[#allocation16_spill] sm:$0xff] }
 0x913   :  { %v297_v13 = vadd.f32 %v289_v43, %v252_v45  ;;  %v298_v40 = vadd.f32 %v290_v17, %v253_v4  ;;  %v119_v61 = vadd.f32 %v111_v62, %v74_v15  ;;  %v120_v0 = vadd.f32 %v112_v53, %v75_v29  ;;  %v3008_v62 = vld [vmem:[#allocation11_spill] sm:$0xff]  ;;  %v3013_v17 = vld [vmem:[#allocation36_spill] sm:$0xff]  ;;  %v3017_v45 = vld [vmem:[#allocation37_spill] sm:$0xff]  ;;  %v2646_v29 = vpop.permute.xlu2 %1296 }
 0x914   :  { %v426_v53 = vsel %vm423_vm13, %v3008_v62, %v3007_v23  ;;  %v514_v4 = vsel %vm513_vm15, %v3017_v45, %v3016_v24  ;;  %v1165_v15 = vmul.f32 %v2446_v9, %v2520_v60  ;;  %vm1413_vm13 = vcmask 801792  }
 0x915   :  { %v342_v32 = vadd.f32 %v334_v41, %v297_v13  ;;  %v343_v2 = vadd.f32 %v335_v22, %v298_v40  ;;  %v164_v5 = vadd.f32 %v156_v63, %v119_v61  ;;  %v165_v58 = vadd.f32 %v157_v51, %v120_v0  ;;  %v3010_v51 = vld [vmem:[#allocation13_spill] sm:$0xff]  ;;  %v3011_v63 = vld [vmem:[#allocation34_spill] sm:$0xff]  ;;  %v3015_v22 = vld [vmem:[#allocation15_spill] sm:$0xff] }
 0x916   :  { %v469_v48 = vsel %vm468_vm14, %v3011_v63, %v3010_v51  ;;  %v470_v39 = vsel %vm468_vm14, %v3010_v51, %v3012_v1  ;;  %v3014_v41 = vld [vmem:[#allocation14_spill] sm:$0xff]  ;;  %v1164_v61 = vmul.f32 %v2443_v49, %v2520_v60  ;;  %v1166_v0 = vmul.f32 %v2453_v59, %v2520_v60  ;;  %v3027_v51 = vld [vmem:[#allocation47_spill] sm:$0xff] }
 0x917   :  { %v387_v44 = vadd.f32 %v379_v21, %v342_v32  ;;  %v388_v14 = vadd.f32 %v380_v30, %v343_v2  ;;  %v209_v47 = vadd.f32 %v201_v6, %v164_v5  ;;  %v210_v43 = vadd.f32 %v202_v7, %v165_v58  ;;  %1184 = vrot.lane.b32.xlu1 %v1168_v57, %s1936_s12  ;;  %v3019_v32 = vld [vmem:[#allocation18_spill] sm:$0xff]  ;;  %v3020_v2 = vld [vmem:[#allocation17_spill] sm:$0xff]  ;;  %v3022_v5 = vld [vmem:[#allocation40_spill] sm:$0xff] }
 0x918   :  { %v472_v42 = vsel %vm468_vm14, %v3014_v41, %v3013_v17  ;;  %1186 = vrot.lane.b32.xlu2 %v1169_v54, %s1936_s12  ;;  %1182 = vrot.lane.b32.xlu0 %v1167_v36, %s1936_s12  ;;  %v471_v21 = vsel %vm468_vm14, %v3015_v22, %v3014_v41  ;;  %v3029_v17 = vld [vmem:[#allocation49_spill] sm:$0xff]  ;;  %vm1458_vm14 = vcmask 793600  }
 0x919   :  { %v432_v6 = vadd.f32 %v424_v56, %v387_v44  ;;  %v433_v7 = vadd.f32 %v425_v38, %v388_v14  ;;  %v254_v33 = vadd.f32 %v246_v11, %v209_v47  ;;  %v255_v18 = vadd.f32 %v247_v12, %v210_v43  ;;  %v3018_v11 = vld [vmem:[#allocation38_spill] sm:$0xff] }
 0x91a   :  { %v515_v12 = vsel %vm513_vm15, %v3016_v24, %v3018_v11  ;;  %v3025_v14 = vld [vmem:[#allocation22_spill] sm:$0xff] }
 0x91b   :  { %v477_v30 = vadd.f32 %v469_v48, %v432_v6  ;;  %v478_v57 = vadd.f32 %v470_v39, %v433_v7  ;;  %v299_v13 = vadd.f32 %v291_v16, %v254_v33  ;;  %v300_v40 = vadd.f32 %v292_v19, %v255_v18  ;;  %v3021_v19 = vld [vmem:[#allocation19_spill] sm:$0xff]  ;;  %v3026_v47 = vld [vmem:[#allocation46_spill] sm:$0xff]  ;;  %v3028_v39 = vld [vmem:[#allocation25_spill] sm:$0xff] }
 0x91c   :  { %v516_v16 = vsel %vm513_vm15, %v3020_v2, %v3019_v32  ;;  %v559_v58 = vsel %vm558_vm5, %v3022_v5, %v3021_v19  ;;  %v560_v38 = vsel %vm558_vm5, %v3021_v19, %v3023_v37  ;;  %v604_v43 = vsel %vm603_vm6, %v3026_v47, %v3025_v14  ;;  %v3030_v6 = vld [vmem:[#allocation50_spill] sm:$0xff]  ;;  %v3039_v19 = vld [vmem:[#allocation56_spill] sm:$0xff] }
 0x91d   :  { %v522_v52 = vadd.f32 %v514_v4, %v477_v30  ;;  %v523_v56 = vadd.f32 %v515_v12, %v478_v57  ;;  %v344_v36 = vadd.f32 %v2584_v25, %v299_v13  ;;  %v345_v54 = vadd.f32 %v337_v26, %v300_v40  ;;  %v1207_v25 = vpop.permute.xlu1 %1206  ;;  %v3024_v26 = vld [vmem:[#allocation39_spill] sm:$0xff]  ;;  %v3031_v4 = vld [vmem:[#allocation28_spill] sm:$0xff]  ;;  %v2692_v40 = vpop.permute.xlu2 %1341 }
 0x91e   :  { %v517_v44 = vsel %vm513_vm15, %v3019_v32, %v3024_v26  ;;  %v605_v63 = vsel %vm603_vm6, %v3025_v14, %v3027_v51  ;;  %v649_v41 = vsel %vm648_vm7, %v3029_v17, %v3028_v39  ;;  %v650_v7 = vsel %vm648_vm7, %v3028_v39, %v3030_v6  ;;  %v3038_v32 = vld [vmem:[#allocation55_spill] sm:$0xff]  ;;  %v3048_v39 = vld [vmem:[#allocation54_spill] sm:$0xff] }
 0x91f   :  { %v567_v23 = vadd.f32 %v559_v58, %v522_v52  ;;  %v568_v60 = vadd.f32 %v560_v38, %v523_v56  ;;  %v389_v62 = vadd.f32 %v381_v28, %v344_v36  ;;  %v390_v10 = vadd.f32 %v382_v46, %v345_v54  ;;  %1178 = vrot.lane.b32.xlu1 %v1165_v15, %s1936_s12  ;;  %v3033_v15 = vld [vmem:[#allocation53_spill] sm:$0xff]  ;;  %v3037_v54 = vld [vmem:[#allocation42_spill] sm:$0xff]  ;;  %v3043_v26 = vld [vmem:[#allocation51_spill] sm:$0xff] }
 0x920   :  { %1180 = vrot.lane.b32.xlu2 %v1166_v0, %s1936_s12  ;;  %1176 = vrot.lane.b32.xlu0 %v1164_v61, %s1936_s12  ;;  %v1213_v33 = vmul.f32 %v2459_v55, %v1207_v25  ;;  %v695_v30 = vsel %vm693_vm8, %v3031_v4, %v3033_v15  ;;  %v1212_v57 = vmul.f32 %v2456_v8, %v1207_v25  ;;  %v3034_v61 = vld [vmem:[#allocation43_spill] sm:$0xff]  ;;  %v3035_v0 = vld [vmem:[#allocation20_spill] sm:$0xff]  ;;  %v3036_v56 = vld [vmem:[#allocation21_spill] sm:$0xff]  ;;  %vm1473_vm15 = vcmask 130048  }
 0x921   :  { %v434_v46 = vadd.f32 %v426_v53, %v389_v62  ;;  %v435_v28 = vadd.f32 %v427_v27, %v390_v10  ;;  %v613_v48 = vadd.f32 %v605_v63, %v568_v60  ;;  %v612_v1 = vadd.f32 %v604_v43, %v567_v23  ;;  %v3032_v53 = vld [vmem:[#allocation52_spill] sm:$0xff]  ;;  %v3042_v10 = vld [vmem:[#allocation23_spill] sm:$0xff]  ;;  %v3049_v17 = vld [vmem:[#allocation30_spill] sm:$0xff] }
 0x922   :  { %v694_v27 = vsel %vm693_vm8, %v3032_v53, %v3031_v4  ;;  %v1214_v13 = vmul.f32 %v2462_v35, %v1207_v25  ;;  %v562_v52 = vsel %vm558_vm5, %v3035_v0, %v3034_v61  ;;  %v561_v36 = vsel %vm558_vm5, %v3036_v56, %v3035_v0  ;;  %v3040_v23 = vld [vmem:[#allocation48_spill] sm:$0xff]  ;;  %v3045_v43 = vld [vmem:[#allocation27_spill] sm:$0xff] }
 0x923   :  { %v479_v18 = vadd.f32 %v471_v21, %v434_v46  ;;  %v480_v22 = vadd.f32 %v472_v42, %v435_v28  ;;  %v658_v24 = vadd.f32 %v650_v7, %v613_v48  ;;  %v657_v45 = vadd.f32 %v649_v41, %v612_v1  ;;  %v3041_v60 = vld [vmem:[#allocation24_spill] sm:$0xff]  ;;  %v3046_v46 = vld [vmem:[#allocation59_spill] sm:$0xff]  ;;  %v3047_v48 = vld [vmem:[#allocation58_spill] sm:$0xff] }
 0x924   :  { %v739_v2 = vsel %vm738_vm9, %v3038_v32, %v3037_v54  ;;  %v740_v5 = vsel %vm738_vm9, %v3037_v54, %v3039_v19  ;;  %v607_v62 = vsel %vm603_vm6, %v3041_v60, %v3040_v23  ;;  %v606_v25 = vsel %vm603_vm6, %v3042_v10, %v3041_v60  ;;  %v3051_v4 = vld [vmem:[#allocation63_spill] sm:$0xff]  ;;  %v3059_v54 = vld [vmem:[#allocation60_spill] sm:$0xff] }
 0x925   :  { %v524_v11 = vadd.f32 %v516_v16, %v479_v18  ;;  %v525_v12 = vadd.f32 %v517_v44, %v480_v22  ;;  %v703_v21 = vadd.f32 %v695_v30, %v658_v24  ;;  %v702_v42 = vadd.f32 %v694_v27, %v657_v45  ;;  %v3044_v44 = vld [vmem:[#allocation26_spill] sm:$0xff]  ;;  %v3050_v24 = vld [vmem:[#allocation64_spill] sm:$0xff]  ;;  %v3052_v27 = vld [vmem:[#allocation29_spill] sm:$0xff] }
 0x926   :  { %v652_v14 = vsel %vm648_vm7, %v3044_v44, %v3043_v26  ;;  %v651_v51 = vsel %vm648_vm7, %v3045_v43, %v3044_v44  ;;  %v697_v41 = vsel %vm693_vm8, %v3049_v17, %v3048_v39  ;;  %v1209_v6 = vmul.f32 %v2443_v49, %v2598_v34  ;;  %v3062_v60 = vld [vmem:[#allocation67_spill] sm:$0xff] }
 0x927   :  { %v569_v16 = vadd.f32 %v561_v36, %v524_v11  ;;  %v570_v58 = vadd.f32 %v562_v52, %v525_v12  ;;  %1229 = vrot.lane.b32.xlu1 %v1213_v33, %s1937_s13  ;;  %v748_v37 = vadd.f32 %v740_v5, %v703_v21  ;;  %v747_v38 = vadd.f32 %v739_v2, %v702_v42  ;;  %v2740_v12 = vpop.permute.xlu2 %1382  ;;  %v3055_v42 = vld [vmem:[#allocation69_spill] sm:$0xff]  ;;  %v3058_v36 = vld [vmem:[#allocation62_spill] sm:$0xff] }
 0x928   :  { %1231 = vrot.lane.b32.xlu2 %v1214_v13, %s1937_s13  ;;  %1227 = vrot.lane.b32.xlu0 %v1212_v57, %s1937_s13  ;;  %v1210_v7 = vmul.f32 %v2446_v9, %v2598_v34  ;;  %v1211_v18 = vmul.f32 %v2453_v59, %v2598_v34  ;;  %v696_v15 = vsel %vm693_vm8, %v3052_v27, %v3049_v17  ;;  %v3053_v57 = vld [vmem:[#allocation57_spill] sm:$0xff]  ;;  %v3054_v13 = vld [vmem:[#allocation44_spill] sm:$0xff]  ;;  %v3060_v5 = vld [vmem:[#allocation74_spill] sm:$0xff] }
 0x929   :  { %v615_v47 = vadd.f32 %v607_v62, %v570_v58  ;;  %v614_v63 = vadd.f32 %v606_v25, %v569_v16  ;;  %v793_v28 = vadd.f32 %v3046_v46, %v748_v37  ;;  %v792_v1 = vadd.f32 %v3047_v48, %v747_v38  ;;  %v3056_v34 = vld [vmem:[#allocation68_spill] sm:$0xff]  ;;  %v3057_v52 = vld [vmem:[#allocation45_spill] sm:$0xff]  ;;  %v1248_v38 = vpop.permute.xlu1 %1247  ;;  %v3069_v17 = vld [vmem:[#allocation66_spill] sm:$0xff] }
 0x92a   :  { %v742_v11 = vsel %vm738_vm9, %v3054_v13, %v3053_v57  ;;  %v741_v56 = vsel %vm738_vm9, %v3057_v52, %v3054_v13  ;;  %v787_v32 = vsel %vm783_vm0, %v3059_v54, %v3058_v36  ;;  %v3061_v58 = vld [vmem:[#allocation73_spill] sm:$0xff]  ;;  %v1258_v44 = vmul.f32 %v2459_v55, %v2506_v20  ;;  %v3067_v46 = vld [vmem:[#allocation72_spill] sm:$0xff]  ;;  %v3073_v27 = vld [vmem:[#allocation82_spill] sm:$0xff] }
 0x92b   :  { %v660_v33 = vadd.f32 %v652_v14, %v615_v47  ;;  %v659_v22 = vadd.f32 %v651_v51, %v614_v63  ;;  %v838_v45 = vadd.f32 %v3050_v24, %v793_v28  ;;  %v837_v53 = vadd.f32 %v3051_v4, %v792_v1  ;;  %v3063_v62 = vld [vmem:[#allocation65_spill] sm:$0xff]  ;;  %v3065_v47 = vld [vmem:[#allocation79_spill] sm:$0xff]  ;;  %v3066_v51 = vld [vmem:[#allocation78_spill] sm:$0xff] }
 0x92c   :  { %v832_v10 = vsel %vm828_vm1, %v3063_v62, %v3062_v60  ;;  %v3064_v25 = vld [vmem:[#allocation61_spill] sm:$0xff]  ;;  %v3068_v28 = vld [vmem:[#allocation70_spill] sm:$0xff]  ;;  %v1257_v1 = vmul.f32 %v2456_v8, %v2506_v20  ;;  %v1259_v39 = vmul.f32 %v2462_v35, %v2506_v20  ;;  %v3074_v20 = vld [vmem:[#allocation80_spill] sm:$0xff]  ;;  %v1254_v52 = vmul.f32 %v2443_v49, %v1248_v38 }
 0x92d   :  { %v705_v30 = vadd.f32 %v697_v41, %v660_v33  ;;  %v704_v21 = vadd.f32 %v696_v15, %v659_v22  ;;  %v883_v61 = vadd.f32 %v3055_v42, %v838_v45  ;;  %v882_v0 = vadd.f32 %v3056_v34, %v837_v53  ;;  %v3071_v22 = vld [vmem:[#allocation75_spill] sm:$0xff]  ;;  %v3076_v13 = vld [vmem:[#allocation81_spill] sm:$0xff] }
 0x92e   :  { %v877_v48 = vsel %vm873_vm2, %v3068_v28, %v3067_v46  ;;  %v3072_v45 = vld [vmem:[#allocation71_spill] sm:$0xff]  ;;  %v967_v15 = vsel %vm963_vm4, %v3074_v20, %v3073_v27  ;;  %v1303_v54 = vmul.f32 %v2459_v55, %v2646_v29  ;;  %v1349_v60 = vmul.f32 %v2462_v35, %v2692_v40 }
 0x92f   :  { %1223 = vrot.lane.b32.xlu1 %v1210_v7, %s1937_s13  ;;  %v750_v2 = vadd.f32 %v742_v11, %v705_v30  ;;  %v749_v19 = vadd.f32 %v741_v56, %v704_v21  ;;  %v928_v16 = vadd.f32 %v3060_v5, %v883_v61  ;;  %v927_v37 = vadd.f32 %v3061_v58, %v882_v0  ;;  %v3075_v30 = vld [vmem:[#allocation76_spill] sm:$0xff]  ;;  %v3077_v61 = vld [vmem:[#allocation83_spill] sm:$0xff] }
 0x930   :  { %1225 = vrot.lane.b32.xlu2 %v1211_v18, %s1937_s13  ;;  %1221 = vrot.lane.b32.xlu0 %v1209_v6, %s1937_s13  ;;  %v3070_v18 = vld [vmem:[#allocation77_spill] sm:$0xff]  ;;  %v1255_v0 = vmul.f32 %v2446_v9, %v1248_v38  ;;  %v1256_v56 = vmul.f32 %v2453_v59, %v1248_v38  ;;  %vm1053_vm0 = vcmask 867328   ;;  %vm1098_vm1 = vcmask 859136  }
 0x931   :  { %v795_v23 = vadd.f32 %v787_v32, %v750_v2  ;;  %v794_v26 = vadd.f32 %v3064_v25, %v749_v19  ;;  %v973_v43 = vadd.f32 %v3065_v47, %v928_v16  ;;  %v972_v63 = vadd.f32 %v3066_v51, %v927_v37  ;;  %v1293_v21 = vpop.permute.xlu1 %1292 }
 0x932   :  { %v922_v24 = vsel %vm918_vm3, %v3071_v22, %v3070_v18  ;;  %v1302_v2 = vmul.f32 %v2456_v8, %v2646_v29  ;;  %v1300_v5 = vmul.f32 %v2446_v9, %v1293_v21  ;;  %v1299_v16 = vmul.f32 %v2443_v49, %v1293_v21 }
 0x933   :  { %v840_v14 = vadd.f32 %v832_v10, %v795_v23  ;;  %v839_v41 = vadd.f32 %v3069_v17, %v794_v26  ;;  %v2772_v7 = vadd.f32 %v2491_v50, %v973_v43  ;;  %v2775_v33 = vadd.f32 %v2489_v3, %v972_v63  ;;  %v2784_v50 = vpop.permute.xlu2 %1427  ;;  %v3078_v43 = vld [vmem:[#allocation84_spill] sm:$0xff] }
 0x934   :  { %v1301_v58 = vmul.f32 %v2453_v59, %v1293_v21  ;;  %v1348_v23 = vmul.f32 %v2459_v55, %v2692_v40  ;;  %v1345_v51 = vmul.f32 %v2446_v9, %v3078_v43  ;;  %v1346_v63 = vmul.f32 %v2453_v59, %v3078_v43 }
 0x935   :  { %v885_v6 = vadd.f32 %v877_v48, %v840_v14  ;;  %v884_v4 = vadd.f32 %v3072_v45, %v839_v41  ;;  %v1390_v20 = vmul.f32 %v2446_v9, %v2740_v12  ;;  %vm1143_vm2 = vcmask 850944  }
 0x936   :  { %vm1188_vm3 = vcmask 842752   ;;  %vm1233_vm4 = vcmask 834560  }
 0x937   :  { %1274 = vrot.lane.b32.xlu1 %v1258_v44, %s1938_s14  ;;  %v930_v53 = vadd.f32 %v922_v24, %v885_v6  ;;  %v929_v3 = vadd.f32 %v3075_v30, %v884_v4  ;;  %v1391_v30 = vmul.f32 %v2453_v59, %v2740_v12 }
 0x938   :  { %1276 = vrot.lane.b32.xlu2 %v1259_v39, %s1938_s14  ;;  %1272 = vrot.lane.b32.xlu0 %v1257_v1, %s1938_s14 }
 0x939   :  { %v975_v57 = vadd.f32 %v967_v15, %v930_v53  ;;  %v974_v11 = vadd.f32 %v3076_v13, %v929_v3  ;;  %v1387_v32 = vpop.permute.xlu1 %1386  ;;  %v1389_v15 = vmul.f32 %v2443_v49, %v2740_v12 }
 0x93a   :  { %v1393_v6 = vmul.f32 %v2459_v55, %v1387_v32  ;;  %v1392_v18 = vmul.f32 %v2456_v8, %v1387_v32  ;;  %v1394_v22 = vmul.f32 %v2462_v35, %v1387_v32 }
 0x93b   :  { %v1020_v42 = vadd.f32 %v2493_v31, %v975_v57  ;;  %v1019_v34 = vadd.f32 %v3077_v61, %v974_v11  ;;  %v1304_v31 = vmul.f32 %v2462_v35, %v2646_v29  ;;  %v1347_v29 = vmul.f32 %v2456_v8, %v2692_v40 }
 0x93c   :  { %v1344_v40 = vmul.f32 %v2443_v49, %v3078_v43 }
 0x93f   :  { %1268 = vrot.lane.b32.xlu1 %v1255_v0, %s1938_s14 }
 0x940   :  { %1270 = vrot.lane.b32.xlu2 %v1256_v56, %s1938_s14  ;;  %1266 = vrot.lane.b32.xlu0 %v1254_v52, %s1938_s14 }
 0x941   :  { %v1432_v37 = vpop.permute.xlu1 %1431 }
 0x942   :  { %v1052_v36 = vpop.permute.xlu2 %1051  ;;  %v1437_v0 = vmul.f32 %v2456_v8, %v1432_v37  ;;  %v1439_v52 = vmul.f32 %v2462_v35, %v1432_v37  ;;  %v1434_v8 = vmul.f32 %v2443_v49, %v2784_v50  ;;  %v1436_v35 = vmul.f32 %v2453_v59, %v2784_v50 }
 0x947   :  { %1319 = vrot.lane.b32.xlu1 %v1303_v54, %s1939_s15 }
 0x948   :  { %1321 = vrot.lane.b32.xlu2 %v1304_v31, %s1939_s15  ;;  %1317 = vrot.lane.b32.xlu0 %v1302_v2, %s1939_s15 }
 0x94a   :  { %v1046_v19 = vpop.permute.xlu2 %1045 }
 0x94f   :  { %1313 = vrot.lane.b32.xlu1 %v1300_v5, %s1939_s15 }
 0x950   :  { %1315 = vrot.lane.b32.xlu2 %v1301_v58, %s1939_s15  ;;  %1311 = vrot.lane.b32.xlu0 %v1299_v16, %s1939_s15 }
 0x952   :  { %v1097_v38 = vpop.permute.xlu2 %1096 }
 0x957   :  { %1364 = vrot.lane.b32.xlu1 %v1348_v23, %s1940_s16 }
 0x958   :  { %1366 = vrot.lane.b32.xlu2 %v1349_v60, %s1940_s16  ;;  %1362 = vrot.lane.b32.xlu0 %v1347_v29, %s1940_s16 }
 0x959   :  { %v1050_v62 = vpop.permute.xlu1 %1049  ;;  %v1048_v10 = vpop.permute.xlu0 %1047 }
 0x95a   :  { %v1057_v25 = vsel %vm1053_vm0, %v1050_v62, %v1052_v36  ;;  %v1056_v26 = vsel %vm1053_vm0, %v1048_v10, %v1050_v62  ;;  %v1091_v44 = vpop.permute.xlu2 %1090 }
 0x95b   :  { %v1065_v14 = vadd.f32 %v1057_v25, %v1020_v42  ;;  %v1064_v47 = vadd.f32 %v1056_v26, %v1019_v34  ;;  %v1438_v34 = vmul.f32 %v2459_v55, %v1432_v37  ;;  %v1435_v55 = vmul.f32 %v2446_v9, %v2784_v50 }
 0x95f   :  { %1358 = vrot.lane.b32.xlu1 %v1345_v51, %s1940_s16 }
 0x960   :  { %1360 = vrot.lane.b32.xlu2 %v1346_v63, %s1940_s16  ;;  %1356 = vrot.lane.b32.xlu0 %v1344_v40, %s1940_s16 }
 0x961   :  { %v1044_v46 = vpop.permute.xlu1 %1043  ;;  %v1042_v28 = vpop.permute.xlu0 %1041 }
 0x962   :  { %v1055_v48 = vsel %vm1053_vm0, %v1044_v46, %v1046_v19  ;;  %v1054_v1 = vsel %vm1053_vm0, %v1042_v28, %v1044_v46  ;;  %v1142_v39 = vpop.permute.xlu2 %1141 }
 0x963   :  { %v1063_v17 = vadd.f32 %v1055_v48, %v2772_v7  ;;  %v1062_v41 = vadd.f32 %v1054_v1, %v2775_v33 }
 0x967   :  { %1409 = vrot.lane.b32.xlu1 %v1393_v6, %s1941_s17 }
 0x968   :  { %1411 = vrot.lane.b32.xlu2 %v1394_v22, %s1941_s17  ;;  %1407 = vrot.lane.b32.xlu0 %v1392_v18, %s1941_s17 }
 0x969   :  { %v1095_v24 = vpop.permute.xlu1 %1094  ;;  %v1093_v45 = vpop.permute.xlu0 %1092 }
 0x96a   :  { %v1102_v4 = vsel %vm1098_vm1, %v1095_v24, %v1097_v38  ;;  %v1101_v53 = vsel %vm1098_vm1, %v1093_v45, %v1095_v24  ;;  %v1136_v7 = vpop.permute.xlu2 %1135 }
 0x96b   :  { %v1110_v27 = vadd.f32 %v1102_v4, %v1065_v14  ;;  %v1109_v33 = vadd.f32 %v1101_v53, %v1064_v47 }
 0x96f   :  { %1403 = vrot.lane.b32.xlu1 %v1390_v20, %s1941_s17 }
 0x970   :  { %1405 = vrot.lane.b32.xlu2 %v1391_v30, %s1941_s17  ;;  %1401 = vrot.lane.b32.xlu0 %v1389_v15, %s1941_s17 }
 0x971   :  { %v1089_v3 = vpop.permute.xlu1 %1088  ;;  %v1087_v57 = vpop.permute.xlu0 %1086 }
 0x972   :  { %v1100_v13 = vsel %vm1098_vm1, %v1089_v3, %v1091_v44  ;;  %v1099_v11 = vsel %vm1098_vm1, %v1087_v57, %v1089_v3  ;;  %v1187_v21 = vpop.permute.xlu2 %1186 }
 0x973   :  { %v1108_v42 = vadd.f32 %v1100_v13, %v1063_v17  ;;  %v1107_v61 = vadd.f32 %v1099_v11, %v1062_v41 }
 0x977   :  { %1454 = vrot.lane.b32.xlu1 %v1438_v34, %s1942_s18 }
 0x978   :  { %1456 = vrot.lane.b32.xlu2 %v1439_v52, %s1942_s18  ;;  %1452 = vrot.lane.b32.xlu0 %v1437_v0, %s1942_s18 }
 0x979   :  { %v1140_v12 = vpop.permute.xlu1 %1139  ;;  %v1138_v56 = vpop.permute.xlu0 %1137 }
 0x97a   :  { %v1147_v36 = vsel %vm1143_vm2, %v1140_v12, %v1142_v39  ;;  %v1146_v54 = vsel %vm1143_vm2, %v1138_v56, %v1140_v12  ;;  %v1181_v32 = vpop.permute.xlu2 %1180 }
 0x97b   :  { %v1155_v2 = vadd.f32 %v1147_v36, %v1110_v27  ;;  %v1154_v31 = vadd.f32 %v1146_v54, %v1109_v33 }
 0x97f   :  { %1448 = vrot.lane.b32.xlu1 %v1435_v55, %s1942_s18 }
 0x980   :  { %1450 = vrot.lane.b32.xlu2 %v1436_v35, %s1942_s18  ;;  %1446 = vrot.lane.b32.xlu0 %v1434_v8, %s1942_s18 }
 0x981   :  { %v1134_v19 = vpop.permute.xlu1 %1133  ;;  %v1132_v5 = vpop.permute.xlu0 %1131 }
 0x982   :  { %v1145_v16 = vsel %vm1143_vm2, %v1134_v19, %v1136_v7  ;;  %v1144_v58 = vsel %vm1143_vm2, %v1132_v5, %v1134_v19  ;;  %v1232_v23 = vpop.permute.xlu2 %1231 }
 0x983   :  { %v1153_v37 = vadd.f32 %v1145_v16, %v1108_v42  ;;  %v1152_v38 = vadd.f32 %v1144_v58, %v1107_v61 }
 0x989   :  { %v1185_v9 = vpop.permute.xlu1 %1184 }
 0x98a   :  { %v1192_v29 = vsel %vm1188_vm3, %v1185_v9, %v1187_v21  ;;  %v1183_v60 = vpop.permute.xlu0 %1182  ;;  %v1226_v59 = vpop.permute.xlu2 %1225 }
 0x98b   :  { %v1200_v49 = vadd.f32 %v1192_v29, %v1155_v2  ;;  %v1191_v62 = vsel %vm1188_vm3, %v1183_v60, %v1185_v9 }
 0x98c   :  { %v1199_v10 = vadd.f32 %v1191_v62, %v1154_v31 }
 0x991   :  { %v1179_v50 = vpop.permute.xlu1 %1178 }
 0x992   :  { %v1190_v25 = vsel %vm1188_vm3, %v1179_v50, %v1181_v32  ;;  %v1177_v26 = vpop.permute.xlu0 %1176  ;;  %v1277_v43 = vpop.permute.xlu2 %1276 }
 0x993   :  { %v1198_v44 = vadd.f32 %v1190_v25, %v1153_v37  ;;  %v1189_v14 = vsel %vm1188_vm3, %v1177_v26, %v1179_v50 }
 0x994   :  { %v1197_v47 = vadd.f32 %v1189_v14, %v1152_v38 }
 0x999   :  { %v1230_v51 = vpop.permute.xlu1 %1229 }
 0x99a   :  { %v1237_v40 = vsel %vm1233_vm4, %v1230_v51, %v1232_v23  ;;  %v1228_v63 = vpop.permute.xlu0 %1227  ;;  %v1271_v1 = vpop.permute.xlu2 %1270 }
 0x99b   :  { %v1245_v46 = vadd.f32 %v1237_v40, %v1200_v49  ;;  %v1236_v28 = vsel %vm1233_vm4, %v1228_v63, %v1230_v51 }
 0x99c   :  { %v1244_v48 = vadd.f32 %v1236_v28, %v1199_v10 }
 0x9a1   :  { %v1224_v39 = vpop.permute.xlu1 %1223 }
 0x9a2   :  { %v1235_v17 = vsel %vm1233_vm4, %v1224_v39, %v1226_v59  ;;  %v1222_v41 = vpop.permute.xlu0 %1221  ;;  %v1322_v4 = vpop.permute.xlu2 %1321 }
 0x9a3   :  { %v1243_v6 = vadd.f32 %v1235_v17, %v1198_v44  ;;  %v1234_v18 = vsel %vm1233_vm4, %v1222_v41, %v1224_v39 }
 0x9a4   :  { %v1242_v22 = vadd.f32 %v1234_v18, %v1197_v47 }
 0x9a9   :  { %v1275_v24 = vpop.permute.xlu1 %1274 }
 0x9aa   :  { %v1273_v45 = vpop.permute.xlu0 %1272  ;;  %v1316_v27 = vpop.permute.xlu2 %1315  ;;  %v1282_v12 = vsel %vm1278_vm10, %v1275_v24, %v1277_v43 }
 0x9ab   :  { %v1281_v56 = vsel %vm1278_vm10, %v1273_v45, %v1275_v24  ;;  %v1290_v2 = vadd.f32 %v1282_v12, %v1245_v46 }
 0x9ac   :  { %v1289_v55 = vadd.f32 %v1281_v56, %v1244_v48 }
 0x9b1   :  { %v1269_v53 = vpop.permute.xlu1 %1268 }
 0x9b2   :  { %v1267_v7 = vpop.permute.xlu0 %1266  ;;  %v1367_v15 = vpop.permute.xlu2 %1366  ;;  %v1280_v23 = vsel %vm1278_vm10, %v1269_v53, %v1271_v1 }
 0x9b3   :  { %v1279_v29 = vsel %vm1278_vm10, %v1267_v7, %v1269_v53  ;;  %v1288_v25 = vadd.f32 %v1280_v23, %v1243_v6  ;;  %v1471_v7 = vld [vmem:[%s2906_s3] sm:$0xff] }
 0x9b4   :  { %v1287_v47 = vadd.f32 %v1279_v29, %v1242_v22 }
 0x9b9   :  { %v1320_v33 = vpop.permute.xlu1 %1319 }
 0x9ba   :  { %v1318_v20 = vpop.permute.xlu0 %1317  ;;  %v1361_v57 = vpop.permute.xlu2 %1360  ;;  %v1327_v54 = vsel %vm1323_vm11, %v1320_v33, %v1322_v4 }
 0x9bb   :  { %v1326_v31 = vsel %vm1323_vm11, %v1318_v20, %v1320_v33  ;;  %v1335_v35 = vadd.f32 %v1327_v54, %v1290_v2  ;;  %v1526_v33 = vld [vmem:[#allocation5] sm:$0x3] }
 0x9bc   :  { %v1334_v5 = vadd.f32 %v1326_v31, %v1289_v55  ;;  %v1528_v20 = vperm.slane %v1526_v33, 0 }
 0x9c1   :  { %v1314_v30 = vpop.permute.xlu1 %1313 }
 0x9c2   :  { %v1312_v3 = vpop.permute.xlu0 %1311  ;;  %v1412_v61 = vpop.permute.xlu2 %1411  ;;  %v1325_v62 = vsel %vm1323_vm11, %v1314_v30, %v1316_v27  ;;  %v1472_v27 = vld [vmem:[%s2906_s3 + $0x8] sm:$0xff] }
 0x9c3   :  { %v1324_v26 = vsel %vm1323_vm11, %v1312_v3, %v1314_v30  ;;  %v1333_v40 = vadd.f32 %v1325_v62, %v1288_v25 }
 0x9c4   :  { %v1332_v46 = vadd.f32 %v1324_v26, %v1287_v47 }
 0x9c9   :  { %v1365_v13 = vpop.permute.xlu1 %1364 }
 0x9ca   :  { %v1363_v11 = vpop.permute.xlu0 %1362  ;;  %v1406_v52 = vpop.permute.xlu2 %1405  ;;  %v1372_v8 = vsel %vm1368_vm12, %v1365_v13, %v1367_v15  ;;  %v1529_v15 = vperm.slane %v1526_v33, 1 }
 0x9cb   :  { %v1371_v19 = vsel %vm1368_vm12, %v1363_v11, %v1365_v13  ;;  %v1380_v58 = vadd.f32 %v1372_v8, %v1335_v35 }
 0x9cc   :  { %v1379_v9 = vadd.f32 %v1371_v19, %v1334_v5 }
 0x9d1   :  { %v1359_v21 = vpop.permute.xlu1 %1358 }
 0x9d2   :  { %v1357_v42 = vpop.permute.xlu0 %1356  ;;  %v1457_v37 = vpop.permute.xlu2 %1456  ;;  %v1370_v43 = vsel %vm1368_vm12, %v1359_v21, %v1361_v57 }
 0x9d3   :  { %v1369_v63 = vsel %vm1368_vm12, %v1357_v42, %v1359_v21  ;;  %v1378_v48 = vadd.f32 %v1370_v43, %v1333_v40  ;;  %v1586_v40 = vld [vmem:[%s2908_s5] sm:$0xff] }
 0x9d4   :  { %v1377_v39 = vadd.f32 %v1369_v63, %v1332_v46 }
 0x9d9   :  { %v1410_v34 = vpop.permute.xlu1 %1409 }
 0x9da   :  { %v1408_v0 = vpop.permute.xlu0 %1407  ;;  %v1417_v16 = vsel %vm1413_vm13, %v1410_v34, %v1412_v61  ;;  %v1451_v17 = vpop.permute.xlu2 %1450 }
 0x9db   :  { %v1416_v38 = vsel %vm1413_vm13, %v1408_v0, %v1410_v34  ;;  %v1425_v60 = vadd.f32 %v1417_v16, %v1380_v58 }
 0x9dc   :  { %v1424_v10 = vadd.f32 %v1416_v38, %v1379_v9 }
 0x9e1   :  { %v1404_v36 = vpop.permute.xlu1 %1403 }
 0x9e2   :  { %v1402_v32 = vpop.permute.xlu0 %1401  ;;  %v1415_v28 = vsel %vm1413_vm13, %v1404_v36, %v1406_v52 }
 0x9e3   :  { %v1414_v1 = vsel %vm1413_vm13, %v1402_v32, %v1404_v36  ;;  %v1423_v41 = vadd.f32 %v1415_v28, %v1378_v48 }
 0x9e4   :  { %v1422_v18 = vadd.f32 %v1414_v1, %v1377_v39  ;;  %v1561_v1 = vld [vmem:[%s2907_s4 + $0x8] sm:$0xff] }
 0x9e9   :  { %v1455_v49 = vpop.permute.xlu1 %1454 }
 0x9ea   :  { %v1462_v59 = vsel %vm1458_vm14, %v1455_v49, %v1457_v37  ;;  %v1453_v50 = vpop.permute.xlu0 %1452 }
 0x9eb   :  { %v1461_v44 = vsel %vm1458_vm14, %v1453_v50, %v1455_v49  ;;  %v1470_v14 = vadd.f32 %v1462_v59, %v1425_v60 }
 0x9ec   :  { %v1469_v51 = vadd.f32 %v1461_v44, %v1424_v10  ;;  %v1560_v44 = vld [vmem:[%s2907_s4] sm:$0xff]  ;;  %s1943_s4 = smov [#allocation7]  }
 0x9ed   :  { %1517 = vmatpush.msra.mxu1 %v1470_v14  ;;  %1650 = vmatpush.msra.mxu3 %v1470_v14  ;;  %s1628_s30 = sshll.u32 %s1943_s4, 4  ;;  %s1629_s30 = int_to_ptr.vmem [resolvable:$true] %s1628_s30 }
 0x9ee   :  { %1494 = vmatpush.msra.mxu0 %v1469_v51  ;;  %1648 = vmatpush.msra.mxu2 %v1469_v51 }
 0x9f1   :  { %v1449_v6 = vpop.permute.xlu1 %1448 }
 0x9f2   :  { %v1460_v22 = vsel %vm1458_vm14, %v1449_v6, %v1451_v17  ;;  %v1447_v24 = vpop.permute.xlu0 %1446 }
 0x9f3   :  { %v1459_v45 = vsel %vm1458_vm14, %v1447_v24, %v1449_v6  ;;  %v1468_v4 = vadd.f32 %v1460_v22, %v1423_v41  ;;  %v1587_v6 = vld [vmem:[%s2908_s5 + $0x8] sm:$0xff]  ;;  %s1944_s5 = smov 256  }
 0x9f4   :  { %v1467_v53 = vadd.f32 %v1459_v45, %v1422_v18 }
 0x9f5   :  { %1518 = vmatpush.msra.mxu1 %v1468_v4  ;;  %1651 = vmatpush.msra.mxu3 %v1468_v4 }
 0x9f6   :  { %1495 = vmatpush.msra.mxu0 %v1467_v53  ;;  %1649 = vmatpush.msra.mxu2 %v1467_v53 }
 0x9f7   :  { %1644 = vmatmul.msk.f32.vlgmr.msra.gmra.mxu0 %vm1473_vm15, %v1471_v7  ;;  %1646 = vmatmul.msk.f32.vlgmr.msra.gmra.mxu1 %vm1473_vm15, %v1471_v7 }
 0x9f8   :  { %1645 = vmatmul.msk.f32.vlgmr.msra.gmra.mxu2 %vm1473_vm15, %v1472_v27  ;;  %1647 = vmatmul.msk.f32.vlgmr.msra.gmra.mxu3 %vm1473_vm15, %v1472_v27 }
 0xa74   :  { %v2872_v30 = vpop.f32.mrf.mxu0  ;;  %v2874_v3 = vpop.f32.mrf.mxu1 }
 0xa75   :  { %v1532_v57 = vmul.f32 %v1528_v20, %v2872_v30  ;;  %v1533_v13 = vmul.f32 %v1529_v15, %v2874_v3 }
 0xa77   :  { %v1542_v11 = vmul.f32 %v1532_v57, %v1532_v57  ;;  %v1536_v21 = vadd.f32 %v1533_v13, %v1532_v57  ;;  %v1543_v42 = vmul.f32 %v1533_v13, %v1533_v13 }
 0xa79   :  { %1537 = vadd.xlane.f32.xlu0 %v1536_v21  ;;  %v1546_v61 = vadd.f32 %v1543_v42, %v1542_v11 }
 0xa7b   :  { %1547 = vadd.xlane.f32.xlu2 %v1546_v61  ;;  %v2878_v34 = vpop.f32.mrf.mxu2  ;;  %v2880_v0 = vpop.f32.mrf.mxu3 }
 0xa7c   :  { %v1534_v52 = vmul.f32 %v1528_v20, %v2878_v34  ;;  %v1535_v12 = vmul.f32 %v1529_v15, %v2880_v0 }
 0xa7e   :  { %v1544_v56 = vmul.f32 %v1534_v52, %v1534_v52  ;;  %v1539_v36 = vadd.f32 %v1535_v12, %v1534_v52  ;;  %v1545_v54 = vmul.f32 %v1535_v12, %v1535_v12 }
 0xa80   :  { %1540 = vadd.xlane.f32.xlu1 %v1539_v36  ;;  %v1549_v32 = vadd.f32 %v1545_v54, %v1544_v56 }
 0xa83   :  { %1550 = vadd.xlane.f32.xlu2 %v1549_v32 }
 0xaec   :  { %v1538_v2 = vpop.xlane.xlu0 %1537 }
 0xaed   :  { %v1552_v31 = vmul.f32 0.005154639, %v1538_v2 }
 0xaee   :  { %v1548_v55 = vpop.xlane.xlu2 %1547 }
 0xaef   :  { %v1556_v8 = vmul.f32 %v1552_v31, %v1552_v31  ;;  %v1554_v35 = vmul.f32 0.005154639, %v1548_v55 }
 0xaf1   :  { %v1558_v19 = vsub.f32 %v1554_v35, %v1556_v8 }
 0xaf3   :  { %v1562_v5 = vadd.f32 1e-05, %v1558_v19  ;;  %v1541_v16 = vpop.xlane.xlu1 %1540 }
 0xaf4   :  { %v1553_v58 = vmul.f32 0.005154639, %v1541_v16 }
 0xaf5   :  { %1786 = vrsqrt.f32 %v1562_v5  ;;  %vm1570_vm6 = vweird.f32 %v1562_v5 }
 0xaf6   :  { %v1557_v37 = vmul.f32 %v1553_v58, %v1553_v58  ;;  %v1551_v38 = vpop.xlane.xlu2 %1550 }
 0xaf7   :  { %v1555_v23 = vmul.f32 0.005154639, %v1551_v38 }
 0xaf9   :  { %v1559_v9 = vsub.f32 %v1555_v23, %v1557_v37 }
 0xafb   :  { %v1787_v29 = vpop.eup %1786  ;;  %v1563_v60 = vadd.f32 1e-05, %v1559_v9 }
 0xafc   :  { %v1565_v49 = vmul.f32 %v1787_v29, %v1562_v5  ;;  %vm1571_vm5 = vweird.f32 %v1787_v29 }
 0xafd   :  { %1788 = vrsqrt.f32 %v1563_v60  ;;  %vm1572_vm7 = vmor %vm1570_vm6, %vm1571_vm5  ;;  %vm1580_vm9 = vweird.f32 %v1563_v60 }
 0xafe   :  { %v1566_v62 = vmul.f32 %v1787_v29, %v1565_v49 }
 0xb00   :  { %v1567_v10 = vmul.f32 0.5, %v1566_v62 }
 0xb02   :  { %v1568_v59 = vsub.f32 1.5, %v1567_v10 }
 0xb03   :  { %v1789_v50 = vpop.eup %1788 }
 0xb04   :  { %v1569_v25 = vmul.f32 %v1787_v29, %v1568_v59  ;;  %v1575_v26 = vmul.f32 %v1789_v50, %v1563_v60  ;;  %vm1581_vm8 = vweird.f32 %v1789_v50 }
 0xb05   :  { %vm1582_vm0 = vmor %vm1580_vm9, %vm1581_vm8 }
 0xb06   :  { %v1576_v14 = vmul.f32 %v1789_v50, %v1575_v26  ;;  %v1573_v47 = vsel %vm1572_vm7, %v1787_v29, %v1569_v25 }
 0xb07   :  { %v1584_v43 = vmul.f32 %v1573_v47, %v1560_v44 }
 0xb08   :  { %v1577_v51 = vmul.f32 0.5, %v1576_v14 }
 0xb09   :  { %1594 = vperm.xlu0 %1779, %v1584_v43   ;;  %v1588_v63 = vmul.f32 %v1584_v43, %v1552_v31 }
 0xb0a   :  { %v1578_v46 = vsub.f32 1.5, %v1577_v51 }
 0xb0b   :  { %v1590_v28 = vsub.f32 %v1586_v40, %v1588_v63 }
 0xb0c   :  { %v1579_v48 = vmul.f32 %v1789_v50, %v1578_v46 }
 0xb0d   :  { %1608 = vperm.xlu2 %1785, %v1590_v28  }
 0xb0e   :  { %v1583_v39 = vsel %vm1582_vm0, %v1789_v50, %v1579_v48 }
 0xb0f   :  { %v1585_v17 = vmul.f32 %v1583_v39, %v1561_v1 }
 0xb11   :  { %1599 = vperm.xlu1 %1784, %v1585_v17   ;;  %v1589_v41 = vmul.f32 %v1585_v17, %v1553_v58 }
 0xb13   :  { %v1591_v18 = vsub.f32 %v1587_v6, %v1589_v41 }
 0xb19   :  { %1613 = vperm.xlu1 %1784, %v1591_v18  }
 0xb67   :  { %v1609_v4 = vpop.permute.xlu2 %1608 }
 0xb7b   :  { %v1595_v22 = vpop.permute.xlu0 %1594 }
 0xb7c   :  { %v1602_v24 = vmul.f32 %v1595_v22, %v2872_v30  ;;  %v1603_v45 = vmul.f32 %v1595_v22, %v2874_v3 }
 0xb7e   :  { %v1616_v53 = vadd.f32 %v1609_v4, %v1602_v24  ;;  %v1617_v7 = vadd.f32 %v1609_v4, %v1603_v45 }
 0xb80   :  { %1620 = vst [vmem:[#allocation7] sm:$0xff] %v1616_v53 }
 0xb81   :  { %1621 = vst [vmem:[#allocation7 + $0x8] sm:$0xff] %v1617_v7 }
 0xb83   :  { %v1600_v27 = vpop.permute.xlu1 %1599 }
 0xb84   :  { %v1604_v33 = vmul.f32 %v1600_v27, %v2878_v34  ;;  %v1605_v20 = vmul.f32 %v1600_v27, %v2880_v0 }
 0xb8b   :  { %v1614_v15 = vpop.permute.xlu1 %1613 }
 0xb8c   :  { %v1618_v30 = vadd.f32 %v1614_v15, %v1604_v33  ;;  %v1619_v57 = vadd.f32 %v1614_v15, %v1605_v20 }
 0xb8e   :  { %1622 = vst [vmem:[#allocation7 + $0x10] sm:$0xff] %v1618_v30 }
 0xb8f   :  { %1623 = vst [vmem:[#allocation7 + $0x18] sm:$0xff] %v1619_v57 }
 0xb90   :  { %1636 = dma.vmem_to_hbm [thread:$0]  %s1629_s30, 512, %s1631_s0, [#allocation4], %s1944_s5, %s1944_s5, %s1945_s1  }
 0xb91   :  { %1874 = dma.done.wait [#allocation4], 512  }
 0xb92   :  { %1875 = vsyncadd [#allocation4], 4294966784 }
 0xb93   :  { %1641 = vsyncpa [#allocation3], 1 }
 0xb94   :  { %1642 = vsyncpa [#allocation6], 1 }
 0xb95   :  { %1643 = vsyncpa [#allocation4], 1 }

</bundles_post_ra>
